<compile_context>
chip_gen: v7x
topology: tpu7x:2x2x1
jax: 0.10.0
libtpu: 0.0.40
codegen_flags: <defaults>
</compile_context>

<pallas_src>
import functools

import jax
import jax.numpy as jnp
from jax import lax
from jax.experimental import pallas as pl
from jax.experimental.pallas import tpu as pltpu

T_TEMPERATURE = 0.05
COS_EPS = 1e-8          # nn.CosineSimilarity default eps
_ROW_TILE_CAP = 8192    # rows per grid step; HBM-bound => want multi-MiB tiles


def _infonce_tile_kernel(q_ref, k_ref, qu_ref, cos_qk_ref, cos_qq_ref):
    """One batch tile: emit lane-dense per-row cos(q,k) and cos(q,queue) as (1, TB)."""
    q = q_ref[...]
    k = k_ref[...]
    qu = qu_ref[...]
    # Upcast only if inputs are sub-f32 (bf16 feeds halve HBM traffic on this
    # mem-bound kernel; v5e's VPU has no bf16 so f32 math everywhere).
    if q.dtype != jnp.float32:
        q = q.astype(jnp.float32)
    if k.dtype != jnp.float32:
        k = k.astype(jnp.float32)
    if qu.dtype != jnp.float32:
        qu = qu.astype(jnp.float32)

    d = q.shape[1]
    ones_row = jnp.ones((1, d), dtype=jnp.float32)
    # ones(1,D) @ P(TB,D)^T on the MXU (same dot_general pattern as q @ k.T in
    # flash attention): the row-reduction over the feature dim lands lane-dense
    # as (1, TB) -- no (TB,1) column result, no transpose/relayout, unmasked
    # full-width stores and a single contiguous writeback DMA per output.
    dims = (((1,), (1,)), ((), ()))  # contract the last dim of both operands

    def row_sum(prod):
        return lax.dot_general(
            ones_row, prod, dims,
            precision=jax.lax.Precision.HIGHEST,   # exact f32 row sums
            preferred_element_type=jnp.float32)

    nq2 = row_sum(q * q)      # (1, TB)
    nk2 = row_sum(k * k)
    nu2 = row_sum(qu * qu)
    dqk = row_sum(q * k)
    dqu = row_sum(q * qu)

    # cos = x.y / max(||x||*||y||, eps)  ==  x.y * rsqrt(max(|x|^2*|y|^2, eps^2))
    eps2 = jnp.float32(COS_EPS * COS_EPS)
    cos_qk_ref[...] = dqk * lax.rsqrt(jnp.maximum(nq2 * nk2, eps2))
    cos_qq_ref[...] = dqu * lax.rsqrt(jnp.maximum(nq2 * nu2, eps2))


def _vmem_budgets():
    """Return (input-stream VMEM budget, vmem_limit_bytes), generation-aware."""
    try:
        phys = pltpu.get_tpu_info().vmem_capacity_bytes
    except Exception:            # older jax / unexpected platform: be conservative
        phys = 64 << 20          # assume the smallest (v7x-class) VMEM
    if phys >= (96 << 20):       # v5e / v6e: 128 MiB physical VMEM per core
        return 56 << 20, 96 << 20
    return 20 << 20, 40 << 20    # v7x-class: 64 MiB physical VMEM per core


def _choose_tile_rows(batch, feat, in_bytes, budget_bytes):
    """Rows per grid step; always a multiple of 128 (lane-dense (1, TB) outputs)."""
    per_row = 3 * 2 * feat * in_bytes      # 3 HBM input streams, double-buffered
    if in_bytes < 4:
        per_row += 3 * feat * 4            # in-kernel f32 upcast copies (bf16 inputs)
    per_row += 2 * feat * 4                # live elementwise-product temporaries (MXU staging)
    per_row += 2 * 2 * 4                   # two (1, TB) f32 outputs, double-buffered
    tb = budget_bytes // max(per_row, 1)
    tb = min(tb, _ROW_TILE_CAP)            # HBM-bound: diminishing returns past ~8K rows
    tb = max(128, (tb // 128) * 128)
    if batch <= tb:                        # single full-batch tile
        return max(128, ((batch + 127) // 128) * 128)
    num_tiles = -(-batch // tb)            # split evenly to minimize padded rows
    rows = -(-batch // num_tiles)
    return ((rows + 127) // 128) * 128


@functools.partial(jax.jit, static_argnames=("t",))
def infonce_loss(q, k, queue, t=T_TEMPERATURE):
    """q, k, queue: [B, D] arrays (row-aligned). Returns scalar float32 loss."""
    assert q.shape == k.shape == queue.shape and q.ndim == 2
    B, D = q.shape

    budget, vmem_limit = _vmem_budgets()
    tb = _choose_tile_rows(B, D, q.dtype.itemsize, budget)
    num_tiles = -(-B // tb)
    b_pad = num_tiles * tb
    if b_pad != B:
        pad = ((0, b_pad - B), (0, 0))
        q = jnp.pad(q, pad)
        k = jnp.pad(k, pad)
        queue = jnp.pad(queue, pad)

    in_spec = pl.BlockSpec((tb, D), lambda i: (i, 0))
    out_spec = pl.BlockSpec((1, tb), lambda i: (0, i))   # lane-dense output blocks

    cos_qk, cos_qq = pl.pallas_call(
        _infonce_tile_kernel,
        out_shape=(
            jax.ShapeDtypeStruct((1, b_pad), jnp.float32),
            jax.ShapeDtypeStruct((1, b_pad), jnp.float32),
        ),
        grid=(num_tiles,),
        in_specs=[in_spec, in_spec, in_spec],
        out_specs=(out_spec, out_spec),
        compiler_params=pltpu.CompilerParams(
            dimension_semantics=("parallel",),   # independent tiles (megacore-friendly)
            vmem_limit_bytes=vmem_limit,
        ),
    )(q, k, queue)

    # O(B) finalization in the wrapper (needs the *global* negative sum).
    c_qk = cos_qk[0, :B]
    c_qq = cos_qq[0, :B]
    inv_t = jnp.float32(1.0 / t)
    neg = jnp.sum(jnp.exp(c_qq * inv_t))
    # -log(pos/(neg+pos)) == log(neg + exp(c/t)) - c/t
    per_row = jnp.log(neg + jnp.exp(c_qk * inv_t)) - c_qk * inv_t
    return jnp.mean(per_row)


def _reference(q, k, queue, t=T_TEMPERATURE, eps=COS_EPS):
    def cos(a, b):
        num = jnp.sum(a * b, axis=1)
        den = jnp.maximum(jnp.linalg.norm(a, axis=1) * jnp.linalg.norm(b, axis=1), eps)
        return num / den

    pos = jnp.exp(cos(q, k) / t)
    neg = jnp.sum(jnp.exp(cos(q, queue) / t))
    return jnp.mean(-jnp.log(pos / (neg + pos)))


if __name__ == "__main__":
    B, D = 8, 32  # correctness-sized harness (perf tuning wants D % 128 == 0, large B)
    key = jax.random.PRNGKey(0)
    kq, kk, kqu = jax.random.split(key, 3)
    q = jax.random.normal(kq, (B, D), dtype=jnp.float32)
    k = jax.random.normal(kk, (B, D), dtype=jnp.float32)
    queue = jax.random.normal(kqu, (B, D), dtype=jnp.float32)

    loss = jax.block_until_ready(infonce_loss(q, k, queue))
    ref = jax.block_until_ready(_reference(q, k, queue))
    assert jnp.allclose(loss, ref, rtol=1e-4, atol=1e-4), (loss, ref)
    print("KERNEL_OK")
</pallas_src>

<mosaic_0001>
module attributes {stable_mosaic.version = 11 : i64} {
  func.func @_infonce_tile_kernel(%arg0: i32, %arg1: memref<128x32xf32, #tpu.memory_space<vmem>>, %arg2: memref<128x32xf32, #tpu.memory_space<vmem>>, %arg3: memref<128x32xf32, #tpu.memory_space<vmem>>, %arg4: memref<1x128xf32, #tpu.memory_space<vmem>>, %arg5: memref<1x128xf32, #tpu.memory_space<vmem>>) attributes {dimension_semantics = [#tpu.dimension_semantics<parallel>], iteration_bounds = array<i64: 1>, scalar_prefetch = 0 : i64, scratch_operands = 0 : i64, tpu.core_type = #tpu.core_type<tc>, window_params = [{transform_indices = @transform_0, window_bounds = array<i64: 128, 32>}, {transform_indices = @transform_1, window_bounds = array<i64: 128, 32>}, {transform_indices = @transform_2, window_bounds = array<i64: 128, 32>}, {transform_indices = @transform_3, window_bounds = array<i64: 1, 128>}, {transform_indices = @transform_4, window_bounds = array<i64: 1, 128>}]} {
    %c0 = arith.constant 0 : index
    %c0_0 = arith.constant 0 : index
    %0 = vector.load %arg1[%c0, %c0_0] : memref<128x32xf32, #tpu.memory_space<vmem>>, vector<128x32xf32>
    %c0_1 = arith.constant 0 : index
    %c0_2 = arith.constant 0 : index
    %1 = vector.load %arg2[%c0_1, %c0_2] : memref<128x32xf32, #tpu.memory_space<vmem>>, vector<128x32xf32>
    %c0_3 = arith.constant 0 : index
    %c0_4 = arith.constant 0 : index
    %2 = vector.load %arg3[%c0_3, %c0_4] : memref<128x32xf32, #tpu.memory_space<vmem>>, vector<128x32xf32>
    %cst = arith.constant 1.000000e+00 : f32
    %3 = vector.broadcast %cst : f32 to vector<1x32xf32>
    %4 = arith.mulf %0, %0 : vector<128x32xf32>
    %cst_5 = arith.constant dense<0.000000e+00> : vector<1x128xf32>
    %5 = tpu.matmul %3, %4, %cst_5 {dimension_numbers = #tpu.dot_dimension_numbers<[1], [1], [0], [0], [0, 0, 1, 0], [], []>, precision = #tpu.contract_precision<fp32>} : vector<1x32xf32>, vector<128x32xf32>, vector<1x128xf32> -> vector<1x128xf32>
    %6 = arith.mulf %1, %1 : vector<128x32xf32>
    %cst_6 = arith.constant dense<0.000000e+00> : vector<1x128xf32>
    %7 = tpu.matmul %3, %6, %cst_6 {dimension_numbers = #tpu.dot_dimension_numbers<[1], [1], [0], [0], [0, 0, 1, 0], [], []>, precision = #tpu.contract_precision<fp32>} : vector<1x32xf32>, vector<128x32xf32>, vector<1x128xf32> -> vector<1x128xf32>
    %8 = arith.mulf %2, %2 : vector<128x32xf32>
    %cst_7 = arith.constant dense<0.000000e+00> : vector<1x128xf32>
    %9 = tpu.matmul %3, %8, %cst_7 {dimension_numbers = #tpu.dot_dimension_numbers<[1], [1], [0], [0], [0, 0, 1, 0], [], []>, precision = #tpu.contract_precision<fp32>} : vector<1x32xf32>, vector<128x32xf32>, vector<1x128xf32> -> vector<1x128xf32>
    %10 = arith.mulf %0, %1 : vector<128x32xf32>
    %cst_8 = arith.constant dense<0.000000e+00> : vector<1x128xf32>
    %11 = tpu.matmul %3, %10, %cst_8 {dimension_numbers = #tpu.dot_dimension_numbers<[1], [1], [0], [0], [0, 0, 1, 0], [], []>, precision = #tpu.contract_precision<fp32>} : vector<1x32xf32>, vector<128x32xf32>, vector<1x128xf32> -> vector<1x128xf32>
    %12 = arith.mulf %0, %2 : vector<128x32xf32>
    %cst_9 = arith.constant dense<0.000000e+00> : vector<1x128xf32>
    %13 = tpu.matmul %3, %12, %cst_9 {dimension_numbers = #tpu.dot_dimension_numbers<[1], [1], [0], [0], [0, 0, 1, 0], [], []>, precision = #tpu.contract_precision<fp32>} : vector<1x32xf32>, vector<128x32xf32>, vector<1x128xf32> -> vector<1x128xf32>
    %14 = arith.mulf %5, %7 : vector<1x128xf32>
    %cst_10 = arith.constant 1.000000e-16 : f32
    %15 = vector.broadcast %cst_10 : f32 to vector<1x128xf32>
    %16 = arith.maximumf %14, %15 : vector<1x128xf32>
    %17 = math.rsqrt %16 : vector<1x128xf32>
    %18 = arith.mulf %11, %17 : vector<1x128xf32>
    %c0_11 = arith.constant 0 : index
    %c0_12 = arith.constant 0 : index
    %19 = vector.load %arg4[%c0_11, %c0_12] : memref<1x128xf32, #tpu.memory_space<vmem>>, vector<1x128xf32>
    tpu.vector_store %arg4[%c0_11, %c0_12], %18 {strides = array<i32>} : memref<1x128xf32, #tpu.memory_space<vmem>>, vector<1x128xf32>,
    %20 = arith.mulf %5, %9 : vector<1x128xf32>
    %cst_13 = arith.constant 1.000000e-16 : f32
    %21 = vector.broadcast %cst_13 : f32 to vector<1x128xf32>
    %22 = arith.maximumf %20, %21 : vector<1x128xf32>
    %23 = math.rsqrt %22 : vector<1x128xf32>
    %24 = arith.mulf %13, %23 : vector<1x128xf32>
    %c0_14 = arith.constant 0 : index
    %c0_15 = arith.constant 0 : index
    %25 = vector.load %arg5[%c0_14, %c0_15] : memref<1x128xf32, #tpu.memory_space<vmem>>, vector<1x128xf32>
    tpu.vector_store %arg5[%c0_14, %c0_15], %24 {strides = array<i32>} : memref<1x128xf32, #tpu.memory_space<vmem>>, vector<1x128xf32>,
    return
  }
  func.func @transform_0(%arg0: i32) -> (i32, i32) {
    %c0_i32 = arith.constant 0 : i32
    %c0_i32_0 = arith.constant 0 : i32
    return %arg0, %c0_i32 : i32, i32
  }
  func.func @transform_1(%arg0: i32) -> (i32, i32) {
    %c0_i32 = arith.constant 0 : i32
    %c0_i32_0 = arith.constant 0 : i32
    return %arg0, %c0_i32 : i32, i32
  }
  func.func @transform_2(%arg0: i32) -> (i32, i32) {
    %c0_i32 = arith.constant 0 : i32
    %c0_i32_0 = arith.constant 0 : i32
    return %arg0, %c0_i32 : i32, i32
  }
  func.func @transform_3(%arg0: i32) -> (i32, i32) {
    %c0_i32 = arith.constant 0 : i32
    %c0_i32_0 = arith.constant 0 : i32
    return %c0_i32, %arg0 : i32, i32
  }
  func.func @transform_4(%arg0: i32) -> (i32, i32) {
    %c0_i32 = arith.constant 0 : i32
    %c0_i32_0 = arith.constant 0 : i32
    return %c0_i32, %arg0 : i32, i32
  }
}

</mosaic_0001>

<bundles_post_ra>
// kernel: infonce_loss.1
= control target key start
LH: loop header
LB: loop body
LE: loop exit
PB: predicated region body
PF: predicated region fallthrough
CT: control target
= control target key end

     0   :  { %v8204_v0 = vmov 0.0|0.0   ;;  %vm80_vm0 = vcmask 261120   ;;  %vm6013_vm1 = vmmov 0   ;;  %v8186_v8 = vmov 0.0   ;;  %s8173_s0 = inlined_call_operand.vmem [shape: f32[128,32], index: 0, kind: input, shape index: {}]   ;;  %s8174_s1 = inlined_call_operand.vmem [shape: f32[128,32], index: 1, kind: input, shape index: {}]   ;;  %s8175_s2 = inlined_call_operand.vmem [shape: f32[128,32], index: 2, kind: input, shape index: {}]   ;;  %s8176_s3 = inlined_call_operand.vmem [shape: f32[1,128], index: 3, kind: output, shape index: {0}]   ;;  %s8177_s4 = inlined_call_operand.vmem [shape: f32[1,128], index: 4, kind: output, shape index: {1}]  }
   0x1   :  { %5186 = vmatprep.subr.bf16.mxu1 %v8204_v0  ;;  %5258 = vmatprep.subr.bf16.mxu0 %v8204_v0  ;;  %v16_v1 = vld [vmem:[%s8173_s0] sm:$0xff]  ;;  %v17_v2 = vld [vmem:[%s8173_s0 + $0x8] sm:$0xff]  ;;  %v18_v3 = vld [vmem:[%s8173_s0 + $0x10] sm:$0xff] }
   0x2   :  { %v64_v4 = vmul.f32 %v16_v1, %v16_v1  ;;  %v65_v5 = vmul.f32 %v17_v2, %v17_v2  ;;  %v19_v6 = vld [vmem:[%s8173_s0 + $0x18] sm:$0xff]  ;;  %v66_v7 = vmul.f32 %v18_v3, %v18_v3  ;;  %4168 = vmatprep.mubr.msk.f32.mxu1 %vm6013_vm1, %v8186_v8  ;;  %4273 = vmatprep.mubr.msk.f32.mxu0 %vm6013_vm1, %v8186_v8  ;;  %v20_v17 = vld [vmem:[%s8173_s0 + $0x20] sm:$0xff]  ;;  %v21_v18 = vld [vmem:[%s8173_s0 + $0x28] sm:$0xff] }
   0x3   :  { %v67_v9 = vmul.f32 %v19_v6, %v19_v6  ;;  %v68_v21 = vmul.f32 %v20_v17, %v20_v17  ;;  %v69_v22 = vmul.f32 %v21_v18, %v21_v18  ;;  %v22_v26 = vld [vmem:[%s8173_s0 + $0x30] sm:$0xff]  ;;  %v23_v27 = vld [vmem:[%s8173_s0 + $0x38] sm:$0xff]  ;;  %v24_v35 = vld [vmem:[%s8173_s0 + $0x40] sm:$0xff] }
   0x4   :  { %v85_v10 = vsel %vm80_vm0, %v64_v4, 0  ;;  %v88_v11 = vsel %vm80_vm0, %v65_v5, 0  ;;  %v91_v14 = vsel %vm80_vm0, %v66_v7, 0  ;;  %v70_v30 = vmul.f32 %v22_v26, %v22_v26  ;;  %v25_v36 = vld [vmem:[%s8173_s0 + $0x48] sm:$0xff]  ;;  %v26_v41 = vld [vmem:[%s8173_s0 + $0x50] sm:$0xff]  ;;  %v27_v42 = vld [vmem:[%s8173_s0 + $0x58] sm:$0xff] }
   0x5   :  { %v133_v12 = vand.u32 4294901760, %v85_v10  ;;  %v136_v13 = vand.u32 4294901760, %v88_v11  ;;  %v94_v15 = vsel %vm80_vm0, %v67_v9, 0  ;;  %v139_v19 = vand.u32 4294901760, %v91_v14  ;;  %v28_v62 = vld [vmem:[%s8173_s0 + $0x60] sm:$0xff]  ;;  %v29_v63 = vld [vmem:[%s8173_s0 + $0x68] sm:$0xff] }
   0x6   :  { %v142_v20 = vand.u32 4294901760, %v94_v15  ;;  %v97_v24 = vsel %vm80_vm0, %v68_v21, 0  ;;  %v100_v25 = vsel %vm80_vm0, %v69_v22, 0  ;;  %v71_v31 = vmul.f32 %v23_v27, %v23_v27  ;;  %v30_v18 = vld [vmem:[%s8173_s0 + $0x70] sm:$0xff] }
   0x7   :  { %v6064_v16 = vpack.c.bf16 %v136_v13, %v133_v12  ;;  %v145_v28 = vand.u32 4294901760, %v97_v24  ;;  %v148_v29 = vand.u32 4294901760, %v100_v25  ;;  %v103_v33 = vsel %vm80_vm0, %v70_v30, 0 }
   0x8   :  { %v6076_v23 = vpack.c.bf16 %v142_v20, %v139_v19  ;;  %v106_v34 = vsel %vm80_vm0, %v71_v31, 0  ;;  %v151_v37 = vand.u32 4294901760, %v103_v33  ;;  %v72_v39 = vmul.f32 %v24_v35, %v24_v35 }
   0x9   :  { %5188 = vmatpush3.bf16.xpose.msra.mxu1 %v6064_v16  ;;  %5260 = vmatpush3.bf16.xpose.msra.mxu0 %v6064_v16  ;;  %v6090_v32 = vpack.c.bf16 %v148_v29, %v145_v28  ;;  %v154_v38 = vand.u32 4294901760, %v106_v34  ;;  %v73_v40 = vmul.f32 %v25_v36, %v25_v36  ;;  %v74_v46 = vmul.f32 %v26_v41, %v26_v41 }
   0xa   :  { %5189 = vmatprep.subr.bf16.mxu1 %v8204_v0  ;;  %5261 = vmatprep.subr.bf16.mxu0 %v8204_v0  ;;  %v109_v44 = vsel %vm80_vm0, %v72_v39, 0  ;;  %v75_v47 = vmul.f32 %v27_v42, %v27_v42  ;;  %v6114_v48 = vsub.f32 %v85_v10, %v133_v12  ;;  %v6116_v49 = vsub.f32 %v88_v11, %v136_v13 }
   0xb   :  { %v6110_v43 = vpack.c.bf16 %v154_v38, %v151_v37  ;;  %v112_v45 = vsel %vm80_vm0, %v73_v40, 0  ;;  %v6118_v50 = vsub.f32 %v91_v14, %v139_v19  ;;  %v157_v51 = vand.u32 4294901760, %v109_v44  ;;  %v31_v19 = vld [vmem:[%s8173_s0 + $0x78] sm:$0xff] }
   0xc   :  { %v160_v52 = vand.u32 4294901760, %v112_v45  ;;  %v6122_v53 = vsub.f32 %v94_v15, %v142_v20  ;;  %v6124_v54 = vsub.f32 %v97_v24, %v145_v28  ;;  %v6126_v55 = vsub.f32 %v100_v25, %v148_v29 }
   0xd   :  { %v6130_v56 = vsub.f32 %v103_v33, %v151_v37  ;;  %v6132_v57 = vsub.f32 %v106_v34, %v154_v38  ;;  %v115_v58 = vsel %vm80_vm0, %v74_v46, 0  ;;  %v118_v59 = vsel %vm80_vm0, %v75_v47, 0 }
   0xe   :  { %v6136_v60 = vsub.f32 %v109_v44, %v157_v51  ;;  %v6138_v61 = vsub.f32 %v112_v45, %v160_v52  ;;  %v5235_v1 = vpack.c.bf16 %v6116_v49, %v6114_v48  ;;  %v5238_v2 = vpack.c.bf16 %v6122_v53, %v6118_v50 }
   0xf   :  { %v6150_v3 = vpack.c.bf16 %v160_v52, %v157_v51  ;;  %v5241_v4 = vpack.c.bf16 %v6126_v55, %v6124_v54  ;;  %v5244_v5 = vpack.c.bf16 %v6132_v57, %v6130_v56  ;;  %v163_v6 = vand.u32 4294901760, %v115_v58 }
  0x10   :  { %v166_v7 = vand.u32 4294901760, %v118_v59  ;;  %v5247_v9 = vpack.c.bf16 %v6138_v61, %v6136_v60  ;;  %v76_v10 = vmul.f32 %v28_v62, %v28_v62  ;;  %v77_v11 = vmul.f32 %v29_v63, %v29_v63 }
  0x11   :  { %5191 = vmatpush3.bf16.xpose.msra.mxu1 %v6076_v23  ;;  %5263 = vmatpush3.bf16.xpose.msra.mxu0 %v6076_v23  ;;  %v6158_v12 = vsub.f32 %v115_v58, %v163_v6  ;;  %v78_v24 = vmul.f32 %v30_v18, %v30_v18  ;;  %v79_v25 = vmul.f32 %v31_v19, %v31_v19  ;;  %v6015_v33 = vmov 0  }
  0x12   :  { %5192 = vmatprep.subr.bf16.mxu1 %v8204_v0  ;;  %5264 = vmatprep.subr.bf16.mxu0 %v8204_v0  ;;  %v6160_v13 = vsub.f32 %v118_v59, %v166_v7  ;;  %v121_v15 = vsel %vm80_vm0, %v76_v10, 0  ;;  %v124_v17 = vsel %vm80_vm0, %v77_v11, 0  ;;  %v6176_v20 = vpack.c.bf16 %v166_v7, %v163_v6 }
  0x13   :  { %v169_v21 = vand.u32 4294901760, %v121_v15  ;;  %v172_v22 = vand.u32 4294901760, %v124_v17  ;;  %v127_v29 = vsel %vm80_vm0, %v78_v24, 0  ;;  %v130_v30 = vsel %vm80_vm0, %v79_v25, 0 }
  0x14   :  { %v5250_v14 = vpack.c.bf16 %v6160_v13, %v6158_v12  ;;  %v82_v34 = vsel %vm80_vm0, 1.0, %v6015_v33  ;;  %v175_v35 = vand.u32 4294901760, %v127_v29  ;;  %v178_v36 = vand.u32 4294901760, %v130_v30 }
  0x15   :  { %v6178_v26 = vsub.f32 %v121_v15, %v169_v21  ;;  %v6180_v27 = vsub.f32 %v124_v17, %v172_v22  ;;  %v6190_v31 = vpack.c.bf16 %v172_v22, %v169_v21  ;;  %v6197_v39 = vsub.f32 %v82_v34, %v82_v34 }
  0x16   :  { %v6193_v37 = vsub.f32 %v127_v29, %v175_v35  ;;  %v6195_v38 = vsub.f32 %v130_v30, %v178_v36  ;;  %v226_v40 = vand.u32 4294901760, %v6114_v48  ;;  %v233_v41 = vand.u32 4294901760, %v6116_v49 }
  0x17   :  { %v5253_v28 = vpack.c.bf16 %v6180_v27, %v6178_v26  ;;  %v6208_v44 = vand.u32 4294901760, %v6197_v39  ;;  %v6210_v45 = vpack.c.bf16 %v178_v36, %v175_v35  ;;  %v240_v59 = vand.u32 4294901760, %v6118_v50 }
  0x18   :  { %v5256_v42 = vpack.c.bf16 %v6195_v38, %v6193_v37  ;;  %v227_v46 = vsub.f32 %v6114_v48, %v226_v40  ;;  %v234_v47 = vsub.f32 %v6116_v49, %v233_v41  ;;  %v247_v62 = vand.u32 4294901760, %v6122_v53 }
  0x19   :  { %5194 = vmatpush3.bf16.xpose.msra.mxu1 %v6090_v32  ;;  %5266 = vmatpush3.bf16.xpose.msra.mxu0 %v6090_v32  ;;  %8315 = vst [vmem:[#allocation2_spill] sm:$0xff] %v6208_v44  ;;  %v216_v51 = vsub.f32 %v6197_v39, %v6208_v44  ;;  %v5283_v7 = vpack.c.bf16 %v233_v41, %v226_v40  ;;  %v254_v18 = vand.u32 4294901760, %v6124_v54  ;;  %v261_v19 = vand.u32 4294901760, %v6126_v55 }
  0x1a   :  { %5195 = vmatprep.subr.bf16.mxu1 %v8204_v0  ;;  %5267 = vmatprep.subr.bf16.mxu0 %v8204_v0  ;;  %v228_v52 = vand.u32 4294901760, %v227_v46  ;;  %v235_v58 = vand.u32 4294901760, %v234_v47  ;;  %v241_v10 = vsub.f32 %v6118_v50, %v240_v59  ;;  %v248_v11 = vsub.f32 %v6122_v53, %v247_v62 }
  0x1b   :  { %v6222_v63 = vand.u32 4294901760, %v216_v51  ;;  %v5286_v22 = vpack.c.bf16 %v247_v62, %v240_v59  ;;  %v255_v24 = vsub.f32 %v6124_v54, %v254_v18  ;;  %v262_v25 = vsub.f32 %v6126_v55, %v261_v19 }
  0x1c   :  { %v5211_v6 = vpack.c.bf16 %v235_v58, %v228_v52  ;;  %v242_v15 = vand.u32 4294901760, %v241_v10  ;;  %v249_v17 = vand.u32 4294901760, %v248_v11  ;;  %v268_v33 = vand.u32 4294901760, %v6130_v56 }
  0x1d   :  { %8316 = vst [vmem:[#allocation3_spill] sm:$0xff] %v6222_v63  ;;  %v256_v29 = vand.u32 4294901760, %v255_v24  ;;  %v263_v30 = vand.u32 4294901760, %v262_v25  ;;  %v275_v34 = vand.u32 4294901760, %v6132_v57  ;;  %v5289_v36 = vpack.c.bf16 %v261_v19, %v254_v18 }
  0x1e   :  { %v5214_v21 = vpack.c.bf16 %v249_v17, %v242_v15  ;;  %v269_v40 = vsub.f32 %v6130_v56, %v268_v33  ;;  %v282_v51 = vand.u32 4294901760, %v6136_v60  ;;  %v289_v52 = vand.u32 4294901760, %v6138_v61 }
  0x1f   :  { %v5217_v35 = vpack.c.bf16 %v263_v30, %v256_v29  ;;  %v276_v41 = vsub.f32 %v6132_v57, %v275_v34  ;;  %v5292_v59 = vpack.c.bf16 %v275_v34, %v268_v33  ;;  %v296_v11 = vand.u32 4294901760, %v6158_v12 }
  0x20   :  { %v270_v46 = vand.u32 4294901760, %v269_v40  ;;  %v283_v62 = vsub.f32 %v6136_v60, %v282_v51  ;;  %v303_v15 = vand.u32 4294901760, %v6160_v13  ;;  %v5295_v18 = vpack.c.bf16 %v289_v52, %v282_v51  ;;  %v34_v60 = vld [vmem:[%s8174_s1 + $0x10] sm:$0xff] }
  0x21   :  { %5197 = vmatpush3.bf16.xpose.msra.mxu1 %v6110_v43  ;;  %5269 = vmatpush3.bf16.xpose.msra.mxu0 %v6110_v43  ;;  %v277_v47 = vand.u32 4294901760, %v276_v41  ;;  %v297_v19 = vsub.f32 %v6158_v12, %v296_v11  ;;  %v310_v25 = vand.u32 4294901760, %v6178_v26  ;;  %v317_v29 = vand.u32 4294901760, %v6180_v27 }
  0x22   :  { %5198 = vmatprep.subr.bf16.mxu1 %v8204_v0  ;;  %5270 = vmatprep.subr.bf16.mxu0 %v8204_v0  ;;  %v5298_v33 = vpack.c.bf16 %v303_v15, %v296_v11  ;;  %v324_v41 = vand.u32 4294901760, %v6193_v37  ;;  %v775_v12 = vmul.f32 %v34_v60, %v34_v60  ;;  %v52_v11 = vld [vmem:[%s8175_s2 + $0x20] sm:$0xff] }
  0x23   :  { %v5220_v58 = vpack.c.bf16 %v277_v47, %v270_v46  ;;  %v311_v34 = vsub.f32 %v6178_v26, %v310_v25  ;;  %v331_v46 = vand.u32 4294901760, %v6195_v38  ;;  %v5301_v51 = vpack.c.bf16 %v317_v29, %v310_v25  ;;  %v40_v60 = vld [vmem:[%s8174_s1 + $0x40] sm:$0xff] }
  0x24   :  { %v1482_v25 = vmul.f32 %v52_v11, %v52_v11 }
  0x29   :  { %5200 = vmatpush3.bf16.xpose.msra.mxu1 %v6150_v3  ;;  %5272 = vmatpush3.bf16.xpose.msra.mxu0 %v6150_v3 }
  0x2a   :  { %5201 = vmatprep.subr.bf16.mxu1 %v8204_v0  ;;  %5273 = vmatprep.subr.bf16.mxu0 %v8204_v0 }
  0x31   :  { %5203 = vmatpush3.bf16.xpose.msra.mxu1 %v6176_v20  ;;  %5275 = vmatpush3.bf16.xpose.msra.mxu0 %v6176_v20 }
  0x32   :  { %5204 = vmatprep.subr.bf16.mxu1 %v8204_v0  ;;  %5276 = vmatprep.subr.bf16.mxu0 %v8204_v0 }
  0x39   :  { %5206 = vmatpush3.bf16.xpose.msra.mxu1 %v6190_v31  ;;  %5278 = vmatpush3.bf16.xpose.msra.mxu0 %v6190_v31 }
  0x3a   :  { %5207 = vmatprep.subr.bf16.mxu1 %v8204_v0  ;;  %5279 = vmatprep.subr.bf16.mxu0 %v8204_v0 }
  0x41   :  { %5209 = vmatpush3.bf16.xpose.msra.mxu1 %v6210_v45  ;;  %5281 = vmatpush3.bf16.xpose.msra.mxu0 %v6210_v45 }
  0x42   :  { %5210 = vmatprep.subr.bf16.mxu1 %v8204_v0  ;;  %5282 = vmatprep.subr.bf16.mxu0 %v8204_v0 }
  0x48   :  { %4169 = vmatmul.mubr.f32.vlgmr.msra.gmra.mrb[0].mxu1 %v6222_v63  ;;  %4274 = vmatmul.mubr.f32.vlgmr.msra.gmra.mrb[0].mxu0 %v6208_v44 }
  0x49   :  { %5212 = vmatpush3.bf16.xpose.msra.mxu1 %v5211_v6  ;;  %5284 = vmatpush3.bf16.xpose.msra.mxu0 %v5283_v7  ;;  %v290_v6 = vsub.f32 %v6138_v61, %v289_v52  ;;  %v284_v7 = vand.u32 4294901760, %v283_v62  ;;  %v325_v52 = vsub.f32 %v6193_v37, %v324_v41  ;;  %v35_v61 = vld [vmem:[%s8174_s1 + $0x18] sm:$0xff] }
  0x4a   :  { %5213 = vmatprep.subr.bf16.mxu1 %v8204_v0  ;;  %5285 = vmatprep.subr.bf16.mxu0 %v8204_v0 }
  0x4b   :  { %4203 = vmatprep.mubr.msk.f32.mxu1 %vm6013_vm1, %v8186_v8  ;;  %4308 = vmatprep.mubr.msk.f32.mxu0 %vm6013_vm1, %v8186_v8  ;;  %v291_v10 = vand.u32 4294901760, %v290_v6 }
  0x4d   :  { %v5223_v17 = vpack.c.bf16 %v291_v10, %v284_v7  ;;  %v5304_v7 = vpack.c.bf16 %v331_v46, %v324_v41  ;;  %v8178_v10 = vmov 1.0   ;;  %v38_v41 = vld [vmem:[%s8174_s1 + $0x30] sm:$0xff] }
  0x51   :  { %5215 = vmatpush3.bf16.xpose.msra.mxu1 %v5214_v21  ;;  %5287 = vmatpush3.bf16.xpose.msra.mxu0 %v5286_v22  ;;  %v304_v21 = vsub.f32 %v6160_v13, %v303_v15  ;;  %v298_v22 = vand.u32 4294901760, %v297_v19  ;;  %v776_v13 = vmul.f32 %v35_v61, %v35_v61  ;;  %v53_v15 = vld [vmem:[%s8175_s2 + $0x28] sm:$0xff] }
  0x52   :  { %5216 = vmatprep.subr.bf16.mxu1 %v8204_v0  ;;  %5288 = vmatprep.subr.bf16.mxu0 %v8204_v0  ;;  %v41_v61 = vld [vmem:[%s8174_s1 + $0x48] sm:$0xff] }
  0x53   :  { %v305_v24 = vand.u32 4294901760, %v304_v21 }
  0x55   :  { %v5226_v30 = vpack.c.bf16 %v305_v24, %v298_v22 }
  0x59   :  { %5218 = vmatpush3.bf16.xpose.msra.mxu1 %v5217_v35  ;;  %5290 = vmatpush3.bf16.xpose.msra.mxu0 %v5289_v36  ;;  %v318_v35 = vsub.f32 %v6180_v27, %v317_v29  ;;  %v312_v36 = vand.u32 4294901760, %v311_v34  ;;  %v1483_v29 = vmul.f32 %v53_v15, %v53_v15 }
  0x5a   :  { %5219 = vmatprep.subr.bf16.mxu1 %v8204_v0  ;;  %5291 = vmatprep.subr.bf16.mxu0 %v8204_v0 }
  0x5b   :  { %v319_v40 = vand.u32 4294901760, %v318_v35 }
  0x5d   :  { %v5229_v47 = vpack.c.bf16 %v319_v40, %v312_v36  ;;  %v6438_v36 = vsel %vm80_vm0, %v1482_v25, 0  ;;  %v6441_v40 = vsel %vm80_vm0, %v1483_v29, 0 }
  0x61   :  { %5221 = vmatpush3.bf16.xpose.msra.mxu1 %v5220_v58  ;;  %5293 = vmatpush3.bf16.xpose.msra.mxu0 %v5292_v59  ;;  %v332_v58 = vsub.f32 %v6195_v38, %v331_v46  ;;  %v326_v59 = vand.u32 4294901760, %v325_v52  ;;  %v39_v46 = vld [vmem:[%s8174_s1 + $0x38] sm:$0xff] }
  0x62   :  { %5222 = vmatprep.subr.bf16.mxu1 %v8204_v0  ;;  %5294 = vmatprep.subr.bf16.mxu0 %v8204_v0 }
  0x63   :  { %v333_v62 = vand.u32 4294901760, %v332_v58 }
  0x65   :  { %v5232_v6 = vpack.c.bf16 %v333_v62, %v326_v59  ;;  %v8195_v59 = vand.u32 4294901760, %v6438_v36  ;;  %v8190_v62 = vand.u32 4294901760, %v6441_v40 }
  0x69   :  { %5224 = vmatpush3.bf16.xpose.msra.mxu1 %v5223_v17  ;;  %5296 = vmatpush3.bf16.xpose.msra.mxu0 %v5295_v18 }
  0x6a   :  { %5225 = vmatprep.subr.bf16.mxu1 %v8204_v0  ;;  %5297 = vmatprep.subr.bf16.mxu0 %v8204_v0 }
  0x71   :  { %5227 = vmatpush3.bf16.xpose.msra.mxu1 %v5226_v30  ;;  %5299 = vmatpush3.bf16.xpose.msra.mxu0 %v5298_v33 }
  0x72   :  { %5228 = vmatprep.subr.bf16.mxu1 %v8204_v0  ;;  %5300 = vmatprep.subr.bf16.mxu0 %v8204_v0 }
  0x79   :  { %5230 = vmatpush3.bf16.xpose.msra.mxu1 %v5229_v47  ;;  %5302 = vmatpush3.bf16.xpose.msra.mxu0 %v5301_v51  ;;  %v54_v47 = vld [vmem:[%s8175_s2 + $0x30] sm:$0xff]  ;;  %v55_v51 = vld [vmem:[%s8175_s2 + $0x38] sm:$0xff] }
  0x7a   :  { %5231 = vmatprep.subr.bf16.mxu1 %v8204_v0  ;;  %5303 = vmatprep.subr.bf16.mxu0 %v8204_v0 }
  0x81   :  { %5233 = vmatpush3.bf16.xpose.msra.mxu1 %v5232_v6  ;;  %5305 = vmatpush3.bf16.xpose.msra.mxu0 %v5304_v7  ;;  %v779_v6 = vmul.f32 %v38_v41, %v38_v41  ;;  %v780_v7 = vmul.f32 %v39_v46, %v39_v46 }
  0x82   :  { %5234 = vmatprep.subr.bf16.mxu1 %v8204_v0  ;;  %5306 = vmatprep.subr.bf16.mxu0 %v8204_v0 }
  0x88   :  { %4204 = vmatmul.mubr.msk.f32.vlgmr.msra.gmra.mrb[0].mxu1 %vm80_vm0, %v8178_v10  ;;  %4309 = vmatmul.mubr.msk.f32.vlgmr.msra.gmra.mrb[0].mxu0 %vm80_vm0, %v8178_v10 }
  0x89   :  { %5236 = vmatpush3.bf16.xpose.msra.mxu1 %v5235_v1  ;;  %5308 = vmatpush3.bf16.xpose.msra.mxu0 %v6064_v16  ;;  %v32_v16 = vld [vmem:[%s8174_s1] sm:$0xff]  ;;  %v50_v1 = vld [vmem:[%s8175_s2 + $0x10] sm:$0xff] }
  0x8a   :  { %5237 = vmatprep.subr.bf16.mxu1 %v8204_v0  ;;  %5309 = vmatprep.subr.bf16.mxu0 %v8204_v0  ;;  %v773_v48 = vmul.f32 %v32_v16, %v32_v16  ;;  %v1484_v16 = vmul.f32 %v54_v47, %v54_v47  ;;  %v42_v47 = vld [vmem:[%s8174_s1 + $0x50] sm:$0xff] }
  0x8b   :  { %4238 = vmatprep.mubr.msk.f32.mxu1 %vm6013_vm1, %v8186_v8  ;;  %4343 = vmatprep.mubr.msk.f32.mxu0 %vm6013_vm1, %v8186_v8 }
  0x8c   :  { %v6335_v54 = vsel %vm80_vm0, %v773_v48, 0  ;;  %v6476_v48 = vsel %vm80_vm0, %v779_v6, 0  ;;  %v58_v6 = vld [vmem:[%s8175_s2 + $0x50] sm:$0xff] }
  0x91   :  { %5239 = vmatpush3.bf16.xpose.msra.mxu1 %v5238_v2  ;;  %5311 = vmatpush3.bf16.xpose.msra.mxu0 %v6076_v23  ;;  %v33_v23 = vld [vmem:[%s8174_s1 + $0x8] sm:$0xff]  ;;  %v51_v2 = vld [vmem:[%s8175_s2 + $0x18] sm:$0xff] }
  0x92   :  { %5240 = vmatprep.subr.bf16.mxu1 %v8204_v0  ;;  %5312 = vmatprep.subr.bf16.mxu0 %v8204_v0  ;;  %v774_v49 = vmul.f32 %v33_v23, %v33_v23  ;;  %v1485_v23 = vmul.f32 %v55_v51, %v55_v51  ;;  %v43_v51 = vld [vmem:[%s8174_s1 + $0x58] sm:$0xff] }
  0x94   :  { %v6338_v55 = vsel %vm80_vm0, %v774_v49, 0  ;;  %v6479_v49 = vsel %vm80_vm0, %v780_v7, 0  ;;  %v59_v7 = vld [vmem:[%s8175_s2 + $0x58] sm:$0xff] }
  0x99   :  { %5242 = vmatpush3.bf16.xpose.msra.mxu1 %v5241_v4  ;;  %5314 = vmatpush3.bf16.xpose.msra.mxu0 %v6090_v32  ;;  %v48_v32 = vld [vmem:[%s8175_s2] sm:$0xff]  ;;  %v841_v4 = vand.u32 4294901760, %v6338_v55 }
  0x9a   :  { %5243 = vmatprep.subr.bf16.mxu1 %v8204_v0  ;;  %5315 = vmatprep.subr.bf16.mxu0 %v8204_v0  ;;  %v1478_v50 = vmul.f32 %v48_v32, %v48_v32 }
  0x9c   :  { %v6341_v56 = vsel %vm80_vm0, %v1478_v50, 0  ;;  %v6482_v50 = vsel %vm80_vm0, %v1484_v16, 0 }
  0xa1   :  { %5245 = vmatpush3.bf16.xpose.msra.mxu1 %v5244_v5  ;;  %5317 = vmatpush3.bf16.xpose.msra.mxu0 %v6110_v43  ;;  %v49_v43 = vld [vmem:[%s8175_s2 + $0x8] sm:$0xff]  ;;  %v1543_v5 = vand.u32 4294901760, %v6341_v56 }
  0xa2   :  { %5246 = vmatprep.subr.bf16.mxu1 %v8204_v0  ;;  %5318 = vmatprep.subr.bf16.mxu0 %v8204_v0  ;;  %v1479_v53 = vmul.f32 %v49_v43, %v49_v43  ;;  %v6473_v43 = vpack.c.bf16 %v8190_v62, %v8195_v59 }
  0xa4   :  { %v6344_v57 = vsel %vm80_vm0, %v1479_v53, 0  ;;  %v6485_v53 = vsel %vm80_vm0, %v1485_v23, 0 }
  0xa9   :  { %5248 = vmatpush3.bf16.xpose.msra.mxu1 %v5247_v9  ;;  %5320 = vmatpush3.bf16.xpose.msra.mxu0 %v6150_v3  ;;  %v838_v3 = vand.u32 4294901760, %v6335_v54  ;;  %v1546_v9 = vand.u32 4294901760, %v6344_v57 }
  0xaa   :  { %5249 = vmatprep.subr.bf16.mxu1 %v8204_v0  ;;  %5321 = vmatprep.subr.bf16.mxu0 %v8204_v0 }
  0xab   :  { %v6372_v26 = vpack.c.bf16 %v841_v4, %v838_v3  ;;  %v6378_v27 = vpack.c.bf16 %v1546_v9, %v1543_v5 }
  0xb1   :  { %5251 = vmatpush3.bf16.xpose.msra.mxu1 %v5250_v14  ;;  %5323 = vmatpush3.bf16.xpose.msra.mxu0 %v6176_v20  ;;  %v1480_v14 = vmul.f32 %v50_v1, %v50_v1  ;;  %v1481_v20 = vmul.f32 %v51_v2, %v51_v2  ;;  %v56_v1 = vld [vmem:[%s8175_s2 + $0x40] sm:$0xff]  ;;  %v57_v2 = vld [vmem:[%s8175_s2 + $0x48] sm:$0xff] }
  0xb2   :  { %5252 = vmatprep.subr.bf16.mxu1 %v8204_v0  ;;  %5324 = vmatprep.subr.bf16.mxu0 %v8204_v0  ;;  %v1486_v11 = vmul.f32 %v56_v1, %v56_v1  ;;  %v1487_v15 = vmul.f32 %v57_v2, %v57_v2  ;;  %v783_v1 = vmul.f32 %v42_v47, %v42_v47 }
  0xb3   :  { %v6387_v37 = vsel %vm80_vm0, %v1480_v14, 0  ;;  %v6390_v38 = vsel %vm80_vm0, %v1481_v20, 0  ;;  %v8185_v14 = vand.u32 4294901760, %v6482_v50  ;;  %v8184_v20 = vand.u32 4294901760, %v6485_v53 }
  0xb4   :  { %v8199_v19 = vand.u32 4294901760, %v6387_v37  ;;  %v8198_v21 = vand.u32 4294901760, %v6390_v38  ;;  %v6526_v41 = vsel %vm80_vm0, %v1486_v11, 0  ;;  %v6529_v46 = vsel %vm80_vm0, %v1487_v15, 0 }
  0xb5   :  { %v784_v2 = vmul.f32 %v43_v51, %v43_v51  ;;  %v6564_v47 = vsel %vm80_vm0, %v783_v1, 0  ;;  %v60_v1 = vld [vmem:[%s8175_s2 + $0x60] sm:$0xff] }
  0xb6   :  { %v6429_v33 = vpack.c.bf16 %v8198_v21, %v8199_v19  ;;  %v6642_v21 = vsub.f32 %v6335_v54, %v838_v3  ;;  %v6647_v19 = vsub.f32 %v6338_v55, %v841_v4 }
  0xb9   :  { %5254 = vmatpush3.bf16.xpose.msra.mxu1 %v5253_v28  ;;  %5326 = vmatpush3.bf16.xpose.msra.mxu0 %v6190_v31  ;;  %v6381_v28 = vsel %vm80_vm0, %v775_v12, 0  ;;  %v6384_v31 = vsel %vm80_vm0, %v776_v13, 0  ;;  %v8189_v12 = vand.u32 4294901760, %v6476_v48  ;;  %v8188_v13 = vand.u32 4294901760, %v6479_v49 }
  0xba   :  { %5255 = vmatprep.subr.bf16.mxu1 %v8204_v0  ;;  %5327 = vmatprep.subr.bf16.mxu0 %v8204_v0  ;;  %v844_v17 = vand.u32 4294901760, %v6381_v28  ;;  %v847_v18 = vand.u32 4294901760, %v6384_v31 }
  0xbc   :  { %v6423_v30 = vpack.c.bf16 %v847_v18, %v844_v17 }
  0xc1   :  { %5257 = vmatpush3.bf16.xpose.msra.mxu1 %v5256_v42  ;;  %5329 = vmatpush3.bf16.xpose.msra.mxu0 %v6210_v45  ;;  %v36_v42 = vld [vmem:[%s8174_s1 + $0x20] sm:$0xff]  ;;  %v37_v45 = vld [vmem:[%s8174_s1 + $0x28] sm:$0xff] }
  0xc2   :  { %5330 = vmatprep.subr.bf16.mxu1 %v8204_v0  ;;  %5474 = vmatprep.subr.bf16.mxu0 %v8204_v0  ;;  %v777_v22 = vmul.f32 %v36_v42, %v36_v42  ;;  %v778_v24 = vmul.f32 %v37_v45, %v37_v45  ;;  %v781_v42 = vmul.f32 %v40_v60, %v40_v60  ;;  %v8181_v60 = vand.u32 4294901760, %v6526_v41 }
  0xc3   :  { %v782_v45 = vmul.f32 %v41_v61, %v41_v61  ;;  %v8180_v61 = vand.u32 4294901760, %v6529_v46 }
  0xc4   :  { %v6432_v34 = vsel %vm80_vm0, %v777_v22, 0  ;;  %v6435_v35 = vsel %vm80_vm0, %v778_v24, 0  ;;  %v6511_v22 = vpack.c.bf16 %v8188_v13, %v8189_v12  ;;  %v6517_v24 = vpack.c.bf16 %v8184_v20, %v8185_v14 }
  0xc5   :  { %v8197_v52 = vand.u32 4294901760, %v6432_v34  ;;  %v8196_v58 = vand.u32 4294901760, %v6435_v35  ;;  %v6520_v25 = vsel %vm80_vm0, %v781_v42, 0  ;;  %v6523_v29 = vsel %vm80_vm0, %v782_v45, 0 }
  0xc6   :  { %v8183_v16 = vand.u32 4294901760, %v6520_v25  ;;  %v8182_v23 = vand.u32 4294901760, %v6523_v29  ;;  %v1488_v42 = vmul.f32 %v58_v6, %v58_v6  ;;  %v1489_v45 = vmul.f32 %v59_v7, %v59_v7  ;;  %v44_v7 = vld [vmem:[%s8174_s1 + $0x60] sm:$0xff] }
  0xc7   :  { %v6467_v32 = vpack.c.bf16 %v8196_v58, %v8197_v52  ;;  %v6561_v15 = vpack.c.bf16 %v8180_v61, %v8181_v60  ;;  %v45_v61 = vld [vmem:[%s8174_s1 + $0x68] sm:$0xff]  ;;  %v1490_v14 = vmul.f32 %v60_v1, %v60_v1 }
  0xc8   :  { %4239 = vmatmul.mubr.f32.vlgmr.msra.gmra.mrb[0].mxu1 %v6197_v39  ;;  %4344 = vmatmul.mubr.msk.f32.vlgmr.msra.gmra.mrb[0].mxu0 %vm80_vm0, %v8178_v10  ;;  %v6555_v11 = vpack.c.bf16 %v8182_v23, %v8183_v16  ;;  %v6567_v10 = vsel %vm80_vm0, %v784_v2, 0  ;;  %v6570_v51 = vsel %vm80_vm0, %v1488_v42, 0  ;;  %v6573_v6 = vsel %vm80_vm0, %v1489_v45, 0  ;;  %v61_v2 = vld [vmem:[%s8175_s2 + $0x68] sm:$0xff] }
  0xc9   :  { %5332 = vmatpush3.bf16.xpose.msra.mxu1 %v6372_v26  ;;  %5476 = vmatpush3.bf16.xpose.msra.mxu0 %v6378_v27  ;;  %8317 = vst [vmem:[#allocation4_spill] sm:$0xff] %v6561_v15  ;;  %v8194_v42 = vand.u32 4294901760, %v6564_v47  ;;  %v8193_v45 = vand.u32 4294901760, %v6567_v10  ;;  %v8192_v60 = vand.u32 4294901760, %v6570_v51  ;;  %v8191_v23 = vand.u32 4294901760, %v6573_v6 }
  0xca   :  { %5333 = vmatprep.subr.bf16.mxu1 %v8204_v0  ;;  %5477 = vmatprep.subr.bf16.mxu0 %v8204_v0  ;;  %v785_v16 = vmul.f32 %v44_v7, %v44_v7  ;;  %v786_v20 = vmul.f32 %v45_v61, %v45_v61  ;;  %v6614_v61 = vsel %vm80_vm0, %v1490_v14, 0  ;;  %v63_v14 = vld [vmem:[%s8175_s2 + $0x78] sm:$0xff] }
  0xcb   :  { %4378 = vmatprep.mubr.msk.f32.mxu1 %vm6013_vm1, %v8186_v8  ;;  %4588 = vmatprep.mubr.msk.f32.mxu0 %vm6013_vm1, %v8186_v8  ;;  %v1491_v8 = vmul.f32 %v61_v2, %v61_v2  ;;  %v6599_v13 = vpack.c.bf16 %v8193_v45, %v8194_v42  ;;  %v6605_v12 = vpack.c.bf16 %v8191_v23, %v8192_v60  ;;  %v46_v2 = vld [vmem:[%s8174_s1 + $0x70] sm:$0xff]  ;;  %v47_v23 = vld [vmem:[%s8174_s1 + $0x78] sm:$0xff]  ;;  %v8201_v60 = vand.u32 4294901760, %v6614_v61 }
  0xcc   :  { %v6608_v7 = vsel %vm80_vm0, %v785_v16, 0  ;;  %v6611_v62 = vsel %vm80_vm0, %v786_v20, 0  ;;  %v62_v16 = vld [vmem:[%s8175_s2 + $0x70] sm:$0xff]  ;;  %v787_v42 = vmul.f32 %v46_v2, %v46_v2  ;;  %v788_v59 = vmul.f32 %v47_v23, %v47_v23 }
  0xcd   :  { %8318 = vst [vmem:[#allocation5_spill] sm:$0xff] %v6599_v13  ;;  %8319 = vst [vmem:[#allocation6_spill] sm:$0xff] %v6605_v12  ;;  %v6617_v1 = vsel %vm80_vm0, %v1491_v8, 0  ;;  %v8203_v20 = vand.u32 4294901760, %v6608_v7  ;;  %v8202_v8 = vand.u32 4294901760, %v6611_v62  ;;  %v1492_v58 = vmul.f32 %v62_v16, %v62_v16 }
  0xce   :  { %v8200_v45 = vand.u32 4294901760, %v6617_v1  ;;  %v1493_v52 = vmul.f32 %v63_v14, %v63_v14  ;;  %v6652_v2 = vsub.f32 %v6341_v56, %v1543_v5  ;;  %v6657_v23 = vsub.f32 %v6344_v57, %v1546_v9 }
  0xcf   :  { %v6663_v54 = vpack.c.bf16 %v8202_v8, %v8203_v20  ;;  %v6672_v56 = vsel %vm80_vm0, %v787_v42, 0  ;;  %v6675_v3 = vsel %vm80_vm0, %v788_v59, 0  ;;  %v6678_v57 = vsel %vm80_vm0, %v1492_v58, 0 }
  0xd0   :  { %v6669_v55 = vpack.c.bf16 %v8200_v45, %v8201_v60  ;;  %v6681_v4 = vsel %vm80_vm0, %v1493_v52, 0  ;;  %v8206_v5 = vand.u32 4294901760, %v6642_v21  ;;  %v8207_v9 = vand.u32 4294901760, %v6647_v19 }
  0xd1   :  { %5335 = vmatpush3.bf16.xpose.msra.mxu1 %v6423_v30  ;;  %5479 = vmatpush3.bf16.xpose.msra.mxu0 %v6429_v33  ;;  %8320 = vst [vmem:[#allocation7_spill] sm:$0xff] %v6663_v54  ;;  %v8209_v16 = vand.u32 4294901760, %v6652_v2  ;;  %v8208_v14 = vand.u32 4294901760, %v6657_v23  ;;  %v8213_v59 = vand.u32 4294901760, %v6672_v56  ;;  %v8212_v58 = vand.u32 4294901760, %v6675_v3 }
  0xd2   :  { %5336 = vmatprep.subr.bf16.mxu1 %v8204_v0  ;;  %5480 = vmatprep.subr.bf16.mxu0 %v8204_v0  ;;  %8321 = vst [vmem:[#allocation8_spill] sm:$0xff] %v6669_v55  ;;  %v8217_v42 = vand.u32 4294901760, %v6678_v57  ;;  %v8216_v52 = vand.u32 4294901760, %v6681_v4  ;;  %v6698_v45 = vsub.f32 %v6381_v28, %v844_v17  ;;  %v6703_v60 = vsub.f32 %v6384_v31, %v847_v18 }
  0xd3   :  { %v932_v8 = vsub.f32 %v6642_v21, %v8206_v5  ;;  %v939_v20 = vsub.f32 %v6647_v19, %v8207_v9  ;;  %v1644_v28 = vsub.f32 %v6657_v23, %v8208_v14  ;;  %v8322_v17 = vand.u32 4294901760, %v6387_v37 }
  0xd4   :  { %v8323_v18 = vand.u32 4294901760, %v6390_v38  ;;  %v6731_v9 = vpack.c.bf16 %v8212_v58, %v8213_v59  ;;  %v6737_v14 = vpack.c.bf16 %v8216_v52, %v8217_v42  ;;  %v8329_v52 = vand.u32 4294901760, %v6438_v36 }
  0xd5   :  { %v6720_v31 = vsub.f32 %v6387_v37, %v8322_v17  ;;  %v940_v37 = vand.u32 4294901760, %v939_v20  ;;  %v1645_v44 = vand.u32 4294901760, %v1644_v28  ;;  %v8327_v20 = vand.u32 4294901760, %v6432_v34 }
  0xd6   :  { %v6725_v5 = vsub.f32 %v6390_v38, %v8323_v18  ;;  %8324 = vst [vmem:[#allocation9_spill] sm:$0xff] %v6731_v9  ;;  %8325 = vst [vmem:[#allocation10_spill] sm:$0xff] %v6737_v14  ;;  %v6760_v42 = vsub.f32 %v6438_v36, %v8329_v52  ;;  %v8330_v59 = vand.u32 4294901760, %v6441_v40 }
  0xd8   :  { %v6765_v58 = vsub.f32 %v6441_v40, %v8330_v59  ;;  %v8334_v52 = vand.u32 4294901760, %v6725_v5  ;;  %v8336_v40 = vand.u32 4294901760, %v6479_v49 }
  0xd9   :  { %5338 = vmatpush3.bf16.xpose.msra.mxu1 %v6467_v32  ;;  %5482 = vmatpush3.bf16.xpose.msra.mxu0 %v6473_v43 }
  0xda   :  { %5339 = vmatprep.subr.bf16.mxu1 %v8204_v0  ;;  %5483 = vmatprep.subr.bf16.mxu0 %v8204_v0 }
  0xe1   :  { %5341 = vmatpush3.bf16.xpose.msra.mxu1 %v6511_v22  ;;  %5485 = vmatpush3.bf16.xpose.msra.mxu0 %v6517_v24 }
  0xe2   :  { %5342 = vmatprep.subr.bf16.mxu1 %v8204_v0  ;;  %5486 = vmatprep.subr.bf16.mxu0 %v8204_v0 }
  0xe9   :  { %5344 = vmatpush3.bf16.xpose.msra.mxu1 %v6555_v11  ;;  %5488 = vmatpush3.bf16.xpose.msra.mxu0 %v6561_v15 }
  0xea   :  { %5345 = vmatprep.subr.bf16.mxu1 %v8204_v0  ;;  %5489 = vmatprep.subr.bf16.mxu0 %v8204_v0 }
  0xf1   :  { %5347 = vmatpush3.bf16.xpose.msra.mxu1 %v6599_v13  ;;  %5491 = vmatpush3.bf16.xpose.msra.mxu0 %v6605_v12 }
  0xf2   :  { %5348 = vmatprep.subr.bf16.mxu1 %v8204_v0  ;;  %5492 = vmatprep.subr.bf16.mxu0 %v8204_v0 }
  0xf9   :  { %5350 = vmatpush3.bf16.xpose.msra.mxu1 %v6663_v54  ;;  %5494 = vmatpush3.bf16.xpose.msra.mxu0 %v6669_v55  ;;  %v8326_v55 = vmov 0.0|0.0  }
  0xfa   :  { %5351 = vmatprep.subr.bf16.mxu1 %v8204_v0  ;;  %5495 = vmatprep.subr.bf16.mxu0 %v8204_v0  ;;  %v1637_v0 = vsub.f32 %v6652_v2, %v8209_v16  ;;  %v933_v16 = vand.u32 4294901760, %v932_v8  ;;  %v8328_v8 = vand.u32 4294901760, %v6435_v35 }
  0xfc   :  { %v1638_v17 = vand.u32 4294901760, %v1637_v0  ;;  %v6750_v0 = vsub.f32 %v6432_v34, %v8327_v20  ;;  %v6755_v28 = vsub.f32 %v6435_v35, %v8328_v8  ;;  %v5355_v18 = vpack.c.bf16 %v940_v37, %v933_v16 }
  0xfd   :  { %v8331_v34 = vand.u32 4294901760, %v6698_v45  ;;  %v8333_v8 = vand.u32 4294901760, %v6720_v31  ;;  %v6795_v16 = vsub.f32 %v6479_v49, %v8336_v40 }
  0xfe   :  { %v5499_v38 = vpack.c.bf16 %v1645_v44, %v1638_v17  ;;  %v8222_v44 = vand.u32 4294901760, %v6750_v0 }
  0xff   :  { %v946_v20 = vsub.f32 %v6698_v45, %v8331_v34  ;;  %v1651_v36 = vsub.f32 %v6720_v31, %v8333_v8  ;;  %v8335_v8 = vand.u32 4294901760, %v6476_v48  ;;  %v8238_v15 = vand.u32 4294901760, %v6795_v16 }
 0x101   :  { %5353 = vmatpush3.bf16.xpose.msra.mxu1 %v6731_v9  ;;  %5497 = vmatpush3.bf16.xpose.msra.mxu0 %v6737_v14  ;;  %v8332_v14 = vand.u32 4294901760, %v6703_v60  ;;  %v1658_v9 = vsub.f32 %v6725_v5, %v8334_v52  ;;  %v947_v59 = vand.u32 4294901760, %v946_v20  ;;  %v1652_v17 = vand.u32 4294901760, %v1651_v36 }
 0x102   :  { %5354 = vmatprep.subr.bf16.mxu1 %v8326_v55  ;;  %5498 = vmatprep.subr.bf16.mxu0 %v8326_v55  ;;  %v6790_v52 = vsub.f32 %v6476_v48, %v8335_v8  ;;  %v8339_v20 = vand.u32 4294901760, %v6760_v42  ;;  %v8340_v36 = vand.u32 4294901760, %v6482_v50  ;;  %v8341_v8 = vand.u32 4294901760, %v6485_v53 }
 0x103   :  { %v953_v35 = vsub.f32 %v6703_v60, %v8332_v14  ;;  %v8231_v14 = vand.u32 4294901760, %v6765_v58  ;;  %v1659_v34 = vand.u32 4294901760, %v1658_v9  ;;  %v960_v9 = vsub.f32 %v6750_v0, %v8222_v44 }
 0x104   :  { %v6816_v40 = vsub.f32 %v6482_v50, %v8340_v36  ;;  %v6821_v44 = vsub.f32 %v6485_v53, %v8341_v8  ;;  %v8342_v53 = vand.u32 4294901760, %v6520_v25 }
 0x105   :  { %v954_v37 = vand.u32 4294901760, %v953_v35  ;;  %v1665_v35 = vsub.f32 %v6760_v42, %v8339_v20  ;;  %v1672_v49 = vsub.f32 %v6765_v58, %v8231_v14  ;;  %v961_v54 = vand.u32 4294901760, %v960_v9 }
 0x106   :  { %v8241_v14 = vand.u32 4294901760, %v6790_v52  ;;  %v8235_v50 = vand.u32 4294901760, %v6816_v40  ;;  %v8234_v36 = vand.u32 4294901760, %v6821_v44  ;;  %v8345_v9 = vand.u32 4294901760, %v6529_v46 }
 0x107   :  { %v1666_v13 = vand.u32 4294901760, %v1665_v35  ;;  %v1673_v20 = vand.u32 4294901760, %v1672_v49 }
 0x108   :  { %4379 = vmatmul.mubr.f32.vlgmr.msra.gmra.mrb[2].mxu1 %v6222_v63  ;;  %4589 = vmatmul.mubr.f32.vlgmr.msra.gmra.mrb[2].mxu0 %v6222_v63  ;;  %v5358_v63 = vpack.c.bf16 %v954_v37, %v947_v59  ;;  %v6832_v59 = vsub.f32 %v6520_v25, %v8342_v53  ;;  %v974_v25 = vsub.f32 %v6790_v52, %v8241_v14 }
 0x109   :  { %5356 = vmatpush3.bf16.xpose.msra.mxu1 %v5355_v18  ;;  %5500 = vmatpush3.bf16.xpose.msra.mxu0 %v5499_v38  ;;  %v8337_v18 = vmov 0.0   ;;  %v8338_v38 = vand.u32 4294901760, %v6755_v28  ;;  %v5505_v49 = vpack.c.bf16 %v1673_v20, %v1666_v13  ;;  %v1686_v8 = vsub.f32 %v6821_v44, %v8234_v36 }
 0x10a   :  { %5357 = vmatprep.subr.bf16.mxu1 %v8326_v55  ;;  %5501 = vmatprep.subr.bf16.mxu0 %v8326_v55  ;;  %v8347_v36 = vand.u32 4294901760, %v6567_v10 }
 0x10b   :  { %4413 = vmatprep.mubr.msk.f32.mxu1 %vm6013_vm1, %v8337_v18  ;;  %4623 = vmatprep.mubr.msk.f32.mxu0 %vm6013_vm1, %v8337_v18  ;;  %v967_v48 = vsub.f32 %v6755_v28, %v8338_v38  ;;  %v5502_v38 = vpack.c.bf16 %v1659_v34, %v1652_v17  ;;  %v8344_v17 = vand.u32 4294901760, %v6526_v41 }
 0x10d   :  { %v968_v12 = vand.u32 4294901760, %v967_v48  ;;  %v6842_v34 = vsub.f32 %v6526_v41, %v8344_v17  ;;  %v6847_v48 = vsub.f32 %v6529_v46, %v8345_v9  ;;  %v1679_v41 = vsub.f32 %v6816_v40, %v8235_v50 }
 0x10e   :  { %v8237_v46 = vand.u32 4294901760, %v6832_v59  ;;  %v8346_v17 = vand.u32 4294901760, %v6564_v47  ;;  %v6875_v50 = vsub.f32 %v6567_v10, %v8347_v36  ;;  %v8349_v36 = vand.u32 4294901760, %v6573_v6 }
 0x10f   :  { %v5361_v35 = vpack.c.bf16 %v968_v12, %v961_v54  ;;  %v8239_v13 = vand.u32 4294901760, %v6842_v34  ;;  %v8240_v54 = vand.u32 4294901760, %v6847_v48  ;;  %v1680_v53 = vand.u32 4294901760, %v1679_v41 }
 0x110   :  { %v6870_v9 = vsub.f32 %v6564_v47, %v8346_v17  ;;  %v6897_v41 = vsub.f32 %v6573_v6, %v8349_v36  ;;  %v8246_v14 = vand.u32 4294901760, %v6875_v50  ;;  %v8350_v6 = vand.u32 4294901760, %v6608_v7 }
 0x111   :  { %5359 = vmatpush3.bf16.xpose.msra.mxu1 %v5358_v63  ;;  %5503 = vmatpush3.bf16.xpose.msra.mxu0 %v5502_v38  ;;  %v8343_v63 = vand.u32 4294901760, %v6523_v29  ;;  %v975_v38 = vand.u32 4294901760, %v974_v25  ;;  %v1693_v25 = vsub.f32 %v6842_v34, %v8239_v13  ;;  %v1700_v47 = vsub.f32 %v6847_v48, %v8240_v54 }
 0x112   :  { %5360 = vmatprep.subr.bf16.mxu1 %v8326_v55  ;;  %5504 = vmatprep.subr.bf16.mxu0 %v8326_v55  ;;  %v8249_v54 = vand.u32 4294901760, %v6870_v9 }
 0x113   :  { %v6837_v37 = vsub.f32 %v6523_v29, %v8343_v63  ;;  %v981_v29 = vsub.f32 %v6795_v16, %v8238_v15  ;;  %v1687_v63 = vand.u32 4294901760, %v1686_v8  ;;  %v1694_v15 = vand.u32 4294901760, %v1693_v25 }
 0x114   :  { %v1701_v13 = vand.u32 4294901760, %v1700_v47 }
 0x115   :  { %v8236_v12 = vand.u32 4294901760, %v6837_v37  ;;  %v982_v20 = vand.u32 4294901760, %v981_v29  ;;  %v8348_v29 = vand.u32 4294901760, %v6570_v51  ;;  %v5508_v17 = vpack.c.bf16 %v1687_v63, %v1680_v53 }
 0x116   :  { %v8352_v63 = vand.u32 4294901760, %v6614_v61  ;;  %v5511_v36 = vpack.c.bf16 %v1701_v13, %v1694_v15 }
 0x117   :  { %v6892_v10 = vsub.f32 %v6570_v51, %v8348_v29  ;;  %v5364_v8 = vpack.c.bf16 %v982_v20, %v975_v38  ;;  %v8242_v29 = vand.u32 4294901760, %v6897_v41  ;;  %v6908_v38 = vsub.f32 %v6608_v7, %v8350_v6 }
 0x118   :  { %v8351_v20 = vand.u32 4294901760, %v6611_v62  ;;  %v1002_v7 = vsub.f32 %v6870_v9, %v8249_v54 }
 0x119   :  { %5362 = vmatpush3.bf16.xpose.msra.mxu1 %v5361_v35  ;;  %5506 = vmatpush3.bf16.xpose.msra.mxu0 %v5505_v49  ;;  %v988_v35 = vsub.f32 %v6832_v59, %v8237_v46  ;;  %v995_v49 = vsub.f32 %v6837_v37, %v8236_v12  ;;  %v8243_v51 = vand.u32 4294901760, %v6892_v10 }
 0x11a   :  { %5363 = vmatprep.subr.bf16.mxu1 %v8326_v55  ;;  %5507 = vmatprep.subr.bf16.mxu0 %v8326_v55  ;;  %v6913_v53 = vsub.f32 %v6611_v62, %v8351_v20  ;;  %v1009_v62 = vsub.f32 %v6875_v50, %v8246_v14  ;;  %v1003_v13 = vand.u32 4294901760, %v1002_v7 }
 0x11b   :  { %v989_v12 = vand.u32 4294901760, %v988_v35  ;;  %v996_v46 = vand.u32 4294901760, %v995_v49  ;;  %v6918_v35 = vsub.f32 %v6614_v61, %v8352_v63  ;;  %v8353_v49 = vand.u32 4294901760, %v6617_v1 }
 0x11c   :  { %v1707_v61 = vsub.f32 %v6892_v10, %v8243_v51  ;;  %v8244_v15 = vand.u32 4294901760, %v6913_v53  ;;  %v8354_v63 = vand.u32 4294901760, %v6672_v56 }
 0x11d   :  { %v6923_v25 = vsub.f32 %v6617_v1, %v8353_v49  ;;  %v5367_v47 = vpack.c.bf16 %v996_v46, %v989_v12  ;;  %v8245_v1 = vand.u32 4294901760, %v6908_v38  ;;  %v8247_v46 = vand.u32 4294901760, %v6918_v35 }
 0x11e   :  { %v1708_v6 = vand.u32 4294901760, %v1707_v61  ;;  %v6946_v49 = vsub.f32 %v6672_v56, %v8354_v63 }
 0x11f   :  { %v8248_v12 = vand.u32 4294901760, %v6923_v25  ;;  %v1721_v7 = vsub.f32 %v6918_v35, %v8247_v46 }
 0x121   :  { %5365 = vmatpush3.bf16.xpose.msra.mxu1 %v5364_v8  ;;  %5509 = vmatpush3.bf16.xpose.msra.mxu0 %v5508_v17  ;;  %v1714_v8 = vsub.f32 %v6897_v41, %v8242_v29  ;;  %v1010_v17 = vand.u32 4294901760, %v1009_v62  ;;  %v8355_v29 = vand.u32 4294901760, %v6675_v3  ;;  %v1728_v56 = vsub.f32 %v6923_v25, %v8248_v12 }
 0x122   :  { %5366 = vmatprep.subr.bf16.mxu1 %v8326_v55  ;;  %5510 = vmatprep.subr.bf16.mxu0 %v8326_v55  ;;  %v8356_v62 = vand.u32 4294901760, %v6678_v57  ;;  %v1722_v14 = vand.u32 4294901760, %v1721_v7  ;;  %v1029_v12 = vand.u32 4294901760, %v6946_v49 }
 0x123   :  { %v1715_v20 = vand.u32 4294901760, %v1714_v8  ;;  %v6951_v51 = vsub.f32 %v6675_v3, %v8355_v29  ;;  %v8357_v29 = vand.u32 4294901760, %v6681_v4  ;;  %v5370_v8 = vpack.c.bf16 %v1010_v17, %v1003_v13 }
 0x124   :  { %v6968_v3 = vsub.f32 %v6678_v57, %v8356_v62  ;;  %v1729_v46 = vand.u32 4294901760, %v1728_v56  ;;  %v1030_v17 = vsub.f32 %v6946_v49, %v1029_v12  ;;  %v5379_v56 = vpack.c.bf16 %v6647_v19, %v6642_v21 }
 0x125   :  { %v6973_v61 = vsub.f32 %v6681_v4, %v8357_v29  ;;  %v5514_v63 = vpack.c.bf16 %v1715_v20, %v1708_v6  ;;  %v1036_v54 = vand.u32 4294901760, %v6951_v51  ;;  %v5523_v29 = vpack.c.bf16 %v6657_v23, %v6652_v2 }
 0x126   :  { %v1734_v57 = vand.u32 4294901760, %v6968_v3  ;;  %v5517_v13 = vpack.c.bf16 %v1729_v46, %v1722_v14 }
 0x127   :  { %v1741_v62 = vand.u32 4294901760, %v6973_v61  ;;  %v1037_v6 = vsub.f32 %v6951_v51, %v1036_v54 }
 0x128   :  { %v1735_v20 = vsub.f32 %v6968_v3, %v1734_v57 }
 0x129   :  { %5368 = vmatpush3.bf16.xpose.msra.mxu1 %v5367_v47  ;;  %5512 = vmatpush3.bf16.xpose.msra.mxu0 %v5511_v36  ;;  %v1016_v47 = vsub.f32 %v6908_v38, %v8245_v1  ;;  %v1023_v36 = vsub.f32 %v6913_v53, %v8244_v15  ;;  %v1038_v14 = vand.u32 4294901760, %v1037_v6  ;;  %v5388_v6 = vpack.c.bf16 %v6795_v16, %v6790_v52 }
 0x12a   :  { %5369 = vmatprep.subr.bf16.mxu1 %v8326_v55  ;;  %5513 = vmatprep.subr.bf16.mxu0 %v8326_v55 }
 0x12b   :  { %v1017_v15 = vand.u32 4294901760, %v1016_v47  ;;  %v1024_v1 = vand.u32 4294901760, %v1023_v36  ;;  %v1742_v47 = vsub.f32 %v6973_v61, %v1741_v62 }
 0x12d   :  { %v5373_v4 = vpack.c.bf16 %v1024_v1, %v1017_v15  ;;  %v1031_v1 = vand.u32 4294901760, %v1030_v17  ;;  %v1736_v15 = vand.u32 4294901760, %v1735_v20  ;;  %v1743_v46 = vand.u32 4294901760, %v1742_v47 }
 0x12e   :  { %v5529_v17 = vpack.c.bf16 %v6765_v58, %v6760_v42  ;;  %v5532_v20 = vpack.c.bf16 %v6821_v44, %v6816_v40  ;;  %v5391_v47 = vpack.c.bf16 %v6837_v37, %v6832_v59 }
 0x12f   :  { %v5376_v36 = vpack.c.bf16 %v1038_v14, %v1031_v1  ;;  %v5520_v7 = vpack.c.bf16 %v1743_v46, %v1736_v15  ;;  %v5535_v1 = vpack.c.bf16 %v6847_v48, %v6842_v34  ;;  %v5394_v14 = vpack.c.bf16 %v6875_v50, %v6870_v9 }
 0x130   :  { %v5538_v15 = vpack.c.bf16 %v6897_v41, %v6892_v10  ;;  %v5397_v46 = vpack.c.bf16 %v6913_v53, %v6908_v38 }
 0x131   :  { %5371 = vmatpush3.bf16.xpose.msra.mxu1 %v5370_v8  ;;  %5515 = vmatpush3.bf16.xpose.msra.mxu0 %v5514_v63  ;;  %v8358_v8 = vmov 1.0   ;;  %v5382_v63 = vpack.c.bf16 %v6703_v60, %v6698_v45 }
 0x132   :  { %5372 = vmatprep.subr.bf16.mxu1 %v8326_v55  ;;  %5516 = vmatprep.subr.bf16.mxu0 %v8326_v55 }
 0x139   :  { %5374 = vmatpush3.bf16.xpose.msra.mxu1 %v5373_v4  ;;  %5518 = vmatpush3.bf16.xpose.msra.mxu0 %v5517_v13  ;;  %v5526_v4 = vpack.c.bf16 %v6725_v5, %v6720_v31  ;;  %v5385_v13 = vpack.c.bf16 %v6755_v28, %v6750_v0 }
 0x13a   :  { %5375 = vmatprep.subr.bf16.mxu1 %v8326_v55  ;;  %5519 = vmatprep.subr.bf16.mxu0 %v8326_v55 }
 0x141   :  { %5377 = vmatpush3.bf16.xpose.msra.mxu1 %v5376_v36  ;;  %5521 = vmatpush3.bf16.xpose.msra.mxu0 %v5520_v7  ;;  %v5541_v36 = vpack.c.bf16 %v6923_v25, %v6918_v35  ;;  %v5400_v7 = vpack.c.bf16 %v6951_v51, %v6946_v49 }
 0x142   :  { %5378 = vmatprep.subr.bf16.mxu1 %v8326_v55  ;;  %5522 = vmatprep.subr.bf16.mxu0 %v8326_v55 }
 0x148   :  { %4414 = vmatmul.mubr.msk.f32.vlgmr.msra.gmra.mrb[2].mxu1 %vm80_vm0, %v8358_v8  ;;  %4624 = vmatmul.mubr.msk.f32.vlgmr.msra.gmra.mrb[2].mxu0 %vm80_vm0, %v8358_v8 }
 0x149   :  { %5380 = vmatpush3.bf16.xpose.msra.mxu1 %v5379_v56  ;;  %5524 = vmatpush3.bf16.xpose.msra.mxu0 %v5523_v29  ;;  %v5544_v56 = vpack.c.bf16 %v6973_v61, %v6968_v3  ;;  %v5970_v61 = vld [vmem:[%s8173_s0 + $0x10] sm:$0xff] }
 0x14a   :  { %5381 = vmatprep.subr.bf16.mxu1 %v8326_v55  ;;  %5525 = vmatprep.subr.bf16.mxu0 %v8326_v55 }
 0x14b   :  { %4448 = vmatprep.mubr.msk.f32.mxu1 %vm6013_vm1, %v8337_v18  ;;  %4658 = vmatprep.mubr.msk.f32.mxu0 %vm6013_vm1, %v8337_v18 }
 0x151   :  { %5383 = vmatpush3.bf16.xpose.msra.mxu1 %v5382_v63  ;;  %5527 = vmatpush3.bf16.xpose.msra.mxu0 %v5526_v4 }
 0x152   :  { %5384 = vmatprep.subr.bf16.mxu1 %v8326_v55  ;;  %5528 = vmatprep.subr.bf16.mxu0 %v8326_v55 }
 0x159   :  { %5386 = vmatpush3.bf16.xpose.msra.mxu1 %v5385_v13  ;;  %5530 = vmatpush3.bf16.xpose.msra.mxu0 %v5529_v17 }
 0x15a   :  { %5387 = vmatprep.subr.bf16.mxu1 %v8326_v55  ;;  %5531 = vmatprep.subr.bf16.mxu0 %v8326_v55 }
 0x161   :  { %5389 = vmatpush3.bf16.xpose.msra.mxu1 %v5388_v6  ;;  %5533 = vmatpush3.bf16.xpose.msra.mxu0 %v5532_v20  ;;  %v8359_v6 = vld [vmem:[#allocation4_spill] sm:$0xff]  ;;  %v8360_v20 = vld [vmem:[#allocation5_spill] sm:$0xff] }
 0x162   :  { %5390 = vmatprep.subr.bf16.mxu1 %v8326_v55  ;;  %5534 = vmatprep.subr.bf16.mxu0 %v8326_v55 }
 0x169   :  { %5392 = vmatpush3.bf16.xpose.msra.mxu1 %v5391_v47  ;;  %5536 = vmatpush3.bf16.xpose.msra.mxu0 %v5535_v1  ;;  %v8361_v47 = vld [vmem:[#allocation6_spill] sm:$0xff]  ;;  %v8362_v1 = vld [vmem:[#allocation7_spill] sm:$0xff] }
 0x16a   :  { %5393 = vmatprep.subr.bf16.mxu1 %v8326_v55  ;;  %5537 = vmatprep.subr.bf16.mxu0 %v8326_v55 }
 0x171   :  { %5395 = vmatpush3.bf16.xpose.msra.mxu1 %v5394_v14  ;;  %5539 = vmatpush3.bf16.xpose.msra.mxu0 %v5538_v15  ;;  %v8363_v14 = vld [vmem:[#allocation8_spill] sm:$0xff]  ;;  %v8364_v15 = vld [vmem:[#allocation9_spill] sm:$0xff] }
 0x172   :  { %5396 = vmatprep.subr.bf16.mxu1 %v8326_v55  ;;  %5540 = vmatprep.subr.bf16.mxu0 %v8326_v55 }
 0x179   :  { %5398 = vmatpush3.bf16.xpose.msra.mxu1 %v5397_v46  ;;  %5542 = vmatpush3.bf16.xpose.msra.mxu0 %v5541_v36  ;;  %v8365_v46 = vld [vmem:[#allocation10_spill] sm:$0xff]  ;;  %v8366_v36 = vand.u32 4294901760, %v6642_v21  ;;  %v8372_v21 = vand.u32 4294901760, %v6703_v60  ;;  %v8378_v60 = vand.u32 4294901760, %v6765_v58  ;;  %v8383_v58 = vand.u32 4294901760, %v6832_v59 }
 0x17a   :  { %5399 = vmatprep.subr.bf16.mxu1 %v8326_v55  ;;  %5543 = vmatprep.subr.bf16.mxu0 %v8326_v55  ;;  %v8389_v59 = vand.u32 4294901760, %v6892_v10  ;;  %v5448_v10 = vpack.c.bf16 %v1036_v54, %v1029_v12 }
 0x181   :  { %5401 = vmatpush3.bf16.xpose.msra.mxu1 %v5400_v7  ;;  %5545 = vmatpush3.bf16.xpose.msra.mxu0 %v5544_v56  ;;  %v8367_v7 = vand.u32 4294901760, %v6647_v19  ;;  %v8371_v19 = vand.u32 4294901760, %v6698_v45  ;;  %v8377_v45 = vand.u32 4294901760, %v6760_v42  ;;  %v8384_v42 = vand.u32 4294901760, %v6837_v37 }
 0x182   :  { %5402 = vmatprep.subr.bf16.mxu1 %v8326_v55  ;;  %5546 = vmatprep.subr.bf16.mxu0 %v8326_v55  ;;  %v8390_v37 = vand.u32 4294901760, %v6897_v41  ;;  %v5592_v41 = vpack.c.bf16 %v1741_v62, %v1734_v57  ;;  %v5971_v57 = vld [vmem:[%s8174_s1 + $0x10] sm:$0xff] }
 0x183   :  { %v5427_v56 = vpack.c.bf16 %v8367_v7, %v8366_v36  ;;  %v8374_v36 = vand.u32 4294901760, %v6725_v5  ;;  %v8379_v5 = vand.u32 4294901760, %v6790_v52  ;;  %v8385_v52 = vand.u32 4294901760, %v6842_v34 }
 0x184   :  { %v8391_v34 = vand.u32 4294901760, %v6908_v38  ;;  %v2185_v62 = vmul.f32 %v5971_v57, %v5970_v61 }
 0x188   :  { %4449 = vmatmul.mubr.f32.vlgmr.msra.gmra.mrb[2].mxu1 %v6197_v39  ;;  %4659 = vmatmul.mubr.f32.vlgmr.msra.gmra.mrb[2].mxu0 %v6197_v39 }
 0x189   :  { %5404 = vmatpush3.bf16.xpose.msra.mxu1 %v6372_v26  ;;  %5548 = vmatpush3.bf16.xpose.msra.mxu0 %v6378_v27 }
 0x18a   :  { %5405 = vmatprep.subr.bf16.mxu1 %v8326_v55  ;;  %5549 = vmatprep.subr.bf16.mxu0 %v8326_v55 }
 0x18b   :  { %4483 = vmatprep.mubr.msk.f32.mxu1 %vm6013_vm1, %v8337_v18  ;;  %4693 = vmatprep.mubr.msk.f32.mxu0 %vm6013_vm1, %v8337_v18 }
 0x191   :  { %5407 = vmatpush3.bf16.xpose.msra.mxu1 %v6423_v30  ;;  %5551 = vmatpush3.bf16.xpose.msra.mxu0 %v6429_v33 }
 0x192   :  { %5408 = vmatprep.subr.bf16.mxu1 %v8326_v55  ;;  %5552 = vmatprep.subr.bf16.mxu0 %v8326_v55 }
 0x199   :  { %5410 = vmatpush3.bf16.xpose.msra.mxu1 %v6467_v32  ;;  %5554 = vmatpush3.bf16.xpose.msra.mxu0 %v6473_v43 }
 0x19a   :  { %5411 = vmatprep.subr.bf16.mxu1 %v8326_v55  ;;  %5555 = vmatprep.subr.bf16.mxu0 %v8326_v55 }
 0x19b   :  { %v474_v29 = vpop.f32.mrb[0].mxu1  ;;  %v769_v63 = vpop.f32.mrb[0].mxu0 }
 0x19c   :  { %v7071_v4 = vadd.f32 %v769_v63, %v474_v29  ;;  %v4240_v13 = vpop.f32.mrb[1].mxu1  ;;  %v4345_v17 = vpop.f32.mrb[1].mxu0  ;;  %v8368_v29 = vand.u32 4294901760, %v6652_v2  ;;  %v8369_v63 = vand.u32 4294901760, %v6657_v23  ;;  %v5430_v2 = vpack.c.bf16 %v8372_v21, %v8371_v19 }
 0x19d   :  { %v8370_v17 = vld [vmem:[#allocation2_spill] sm:$0xff]  ;;  %v8373_v23 = vand.u32 4294901760, %v6720_v31  ;;  %v8380_v31 = vand.u32 4294901760, %v6795_v16  ;;  %v8386_v16 = vand.u32 4294901760, %v6847_v48  ;;  %v8392_v48 = vand.u32 4294901760, %v6913_v53 }
 0x19e   :  { %v5571_v13 = vpack.c.bf16 %v8369_v63, %v8368_v29  ;;  %v8376_v29 = vand.u32 4294901760, %v6755_v28  ;;  %v8382_v28 = vand.u32 4294901760, %v6821_v44  ;;  %v8387_v44 = vand.u32 4294901760, %v6870_v9 }
 0x19f   :  { %v5574_v7 = vpack.c.bf16 %v8374_v36, %v8373_v23  ;;  %v5436_v19 = vpack.c.bf16 %v8380_v31, %v8379_v5  ;;  %v5583_v23 = vpack.c.bf16 %v8386_v16, %v8385_v52  ;;  %v8393_v9 = vand.u32 4294901760, %v6918_v35  ;;  %v5978_v52 = vld [vmem:[%s8173_s0 + $0x28] sm:$0xff] }
 0x1a0   :  { %v5979_v16 = vld [vmem:[%s8174_s1 + $0x28] sm:$0xff] }
 0x1a1   :  { %5413 = vmatpush3.bf16.xpose.msra.mxu1 %v6511_v22  ;;  %5557 = vmatpush3.bf16.xpose.msra.mxu0 %v6517_v24 }
 0x1a2   :  { %5414 = vmatprep.subr.bf16.mxu1 %v8326_v55  ;;  %5558 = vmatprep.subr.bf16.mxu0 %v8326_v55 }
 0x1a9   :  { %5416 = vmatpush3.bf16.xpose.msra.mxu1 %v6555_v11  ;;  %5560 = vmatpush3.bf16.xpose.msra.mxu0 %v8359_v6 }
 0x1aa   :  { %5417 = vmatprep.subr.bf16.mxu1 %v8326_v55  ;;  %5561 = vmatprep.subr.bf16.mxu0 %v8326_v55 }
 0x1b1   :  { %5419 = vmatpush3.bf16.xpose.msra.mxu1 %v8360_v20  ;;  %5563 = vmatpush3.bf16.xpose.msra.mxu0 %v8361_v47 }
 0x1b2   :  { %5420 = vmatprep.subr.bf16.mxu1 %v8326_v55  ;;  %5564 = vmatprep.subr.bf16.mxu0 %v8326_v55 }
 0x1b9   :  { %5422 = vmatpush3.bf16.xpose.msra.mxu1 %v8362_v1  ;;  %5566 = vmatpush3.bf16.xpose.msra.mxu0 %v8363_v14 }
 0x1ba   :  { %5423 = vmatprep.subr.bf16.mxu1 %v8326_v55  ;;  %5567 = vmatprep.subr.bf16.mxu0 %v8326_v55 }
 0x1c1   :  { %5425 = vmatpush3.bf16.xpose.msra.mxu1 %v8364_v15  ;;  %5569 = vmatpush3.bf16.xpose.msra.mxu0 %v8365_v46 }
 0x1c2   :  { %5426 = vmatprep.subr.bf16.mxu1 %v8326_v55  ;;  %5570 = vmatprep.subr.bf16.mxu0 %v8326_v55 }
 0x1c8   :  { %4484 = vmatmul.mubr.f32.vlgmr.msra.gmra.mrb[2].mxu1 %v8370_v17  ;;  %4694 = vmatmul.mubr.f32.vlgmr.msra.gmra.mrb[2].mxu0 %v8370_v17 }
 0x1c9   :  { %5428 = vmatpush3.bf16.xpose.msra.mxu1 %v5427_v56  ;;  %5572 = vmatpush3.bf16.xpose.msra.mxu0 %v5571_v13  ;;  %v8375_v56 = vand.u32 4294901760, %v6750_v0  ;;  %v5577_v13 = vpack.c.bf16 %v8378_v60, %v8377_v45  ;;  %v8381_v0 = vand.u32 4294901760, %v6816_v40  ;;  %v8388_v40 = vand.u32 4294901760, %v6875_v50 }
 0x1ca   :  { %5429 = vmatprep.subr.bf16.mxu1 %v8326_v55  ;;  %5573 = vmatprep.subr.bf16.mxu0 %v8326_v55  ;;  %v8394_v50 = vand.u32 4294901760, %v6923_v25  ;;  %v7284_v60 = vsel %vm80_vm0, %v2185_v62, 0 }
 0x1cb   :  { %4518 = vmatprep.mubr.msk.f32.mxu1 %vm6013_vm1, %v8337_v18  ;;  %4728 = vmatprep.mubr.msk.f32.mxu0 %vm6013_vm1, %v8337_v18  ;;  %v5433_v63 = vpack.c.bf16 %v8376_v29, %v8375_v56  ;;  %v5580_v21 = vpack.c.bf16 %v8382_v28, %v8381_v0  ;;  %v5442_v36 = vpack.c.bf16 %v8388_v40, %v8387_v44  ;;  %v5980_v44 = vld [vmem:[%s8175_s2 + $0x20] sm:$0xff] }
 0x1cc   :  { %v5445_v56 = vpack.c.bf16 %v8392_v48, %v8391_v34  ;;  %v5589_v29 = vpack.c.bf16 %v8394_v50, %v8393_v9 }
 0x1d1   :  { %5431 = vmatpush3.bf16.xpose.msra.mxu1 %v5430_v2  ;;  %5575 = vmatpush3.bf16.xpose.msra.mxu0 %v5574_v7  ;;  %v5439_v2 = vpack.c.bf16 %v8384_v42, %v8383_v58  ;;  %v5586_v7 = vpack.c.bf16 %v8390_v37, %v8389_v59  ;;  %v5976_v58 = vld [vmem:[%s8173_s0 + $0x20] sm:$0xff] }
 0x1d2   :  { %5432 = vmatprep.subr.bf16.mxu1 %v8326_v55  ;;  %5576 = vmatprep.subr.bf16.mxu0 %v8326_v55  ;;  %v5977_v42 = vld [vmem:[%s8174_s1 + $0x20] sm:$0xff]  ;;  %v2892_v40 = vmul.f32 %v5980_v44, %v5976_v58 }
 0x1d3   :  { %v5992_v44 = vld [vmem:[%s8175_s2 + $0x40] sm:$0xff] }
 0x1d9   :  { %5434 = vmatpush3.bf16.xpose.msra.mxu1 %v5433_v63  ;;  %5578 = vmatpush3.bf16.xpose.msra.mxu0 %v5577_v13 }
 0x1da   :  { %5435 = vmatprep.subr.bf16.mxu1 %v8326_v55  ;;  %5579 = vmatprep.subr.bf16.mxu0 %v8326_v55 }
 0x1e1   :  { %5437 = vmatpush3.bf16.xpose.msra.mxu1 %v5436_v19  ;;  %5581 = vmatpush3.bf16.xpose.msra.mxu0 %v5580_v21  ;;  %v8269_v19 = vand.u32 4294901760, %v7284_v60 }
 0x1e2   :  { %5438 = vmatprep.subr.bf16.mxu1 %v8326_v55  ;;  %5582 = vmatprep.subr.bf16.mxu0 %v8326_v55 }
 0x1e9   :  { %5440 = vmatpush3.bf16.xpose.msra.mxu1 %v5439_v2  ;;  %5584 = vmatpush3.bf16.xpose.msra.mxu0 %v5583_v23  ;;  %v2187_v2 = vmul.f32 %v5977_v42, %v5976_v58  ;;  %v2188_v23 = vmul.f32 %v5979_v16, %v5978_v52  ;;  %v5988_v58 = vld [vmem:[%s8173_s0 + $0x40] sm:$0xff]  ;;  %v5991_v16 = vld [vmem:[%s8174_s1 + $0x48] sm:$0xff] }
 0x1ea   :  { %5441 = vmatprep.subr.bf16.mxu1 %v8326_v55  ;;  %5585 = vmatprep.subr.bf16.mxu0 %v8326_v55  ;;  %v5989_v42 = vld [vmem:[%s8174_s1 + $0x40] sm:$0xff] }
 0x1eb   :  { %v7342_v34 = vsel %vm80_vm0, %v2187_v2, 0  ;;  %v7345_v48 = vsel %vm80_vm0, %v2188_v23, 0  ;;  %v2191_v2 = vmul.f32 %v5989_v42, %v5988_v58  ;;  %v5995_v42 = vld [vmem:[%s8174_s1 + $0x50] sm:$0xff] }
 0x1ec   :  { %v8265_v50 = vand.u32 4294901760, %v7342_v34 }
 0x1f1   :  { %5443 = vmatpush3.bf16.xpose.msra.mxu1 %v5442_v36  ;;  %5587 = vmatpush3.bf16.xpose.msra.mxu0 %v5586_v7  ;;  %v5981_v36 = vld [vmem:[%s8175_s2 + $0x28] sm:$0xff] }
 0x1f2   :  { %5444 = vmatprep.subr.bf16.mxu1 %v8326_v55  ;;  %5588 = vmatprep.subr.bf16.mxu0 %v8326_v55  ;;  %v2893_v59 = vmul.f32 %v5981_v36, %v5978_v52  ;;  %v5990_v52 = vld [vmem:[%s8173_s0 + $0x48] sm:$0xff] }
 0x1f3   :  { %v2192_v23 = vmul.f32 %v5991_v16, %v5990_v52  ;;  %v5993_v36 = vld [vmem:[%s8175_s2 + $0x48] sm:$0xff]  ;;  %v5997_v16 = vld [vmem:[%s8174_s1 + $0x58] sm:$0xff] }
 0x1f4   :  { %v7351_v9 = vsel %vm80_vm0, %v2893_v59, 0  ;;  %v2897_v59 = vmul.f32 %v5993_v36, %v5990_v52  ;;  %v5996_v52 = vld [vmem:[%s8173_s0 + $0x58] sm:$0xff] }
 0x1f5   :  { %v5999_v36 = vld [vmem:[%s8175_s2 + $0x58] sm:$0xff] }
 0x1f9   :  { %5446 = vmatpush3.bf16.xpose.msra.mxu1 %v5445_v56  ;;  %5590 = vmatpush3.bf16.xpose.msra.mxu0 %v5589_v29  ;;  %v7348_v56 = vsel %vm80_vm0, %v2892_v40, 0  ;;  %v8260_v29 = vand.u32 4294901760, %v7345_v48  ;;  %v2896_v40 = vmul.f32 %v5992_v44, %v5988_v58  ;;  %v5994_v58 = vld [vmem:[%s8173_s0 + $0x50] sm:$0xff] }
 0x1fa   :  { %5447 = vmatprep.subr.bf16.mxu1 %v8326_v55  ;;  %5591 = vmatprep.subr.bf16.mxu0 %v8326_v55  ;;  %v5998_v44 = vld [vmem:[%s8175_s2 + $0x50] sm:$0xff] }
 0x201   :  { %5449 = vmatpush3.bf16.xpose.msra.mxu1 %v5448_v10  ;;  %5593 = vmatpush3.bf16.xpose.msra.mxu0 %v5592_v41  ;;  %v8259_v10 = vand.u32 4294901760, %v7348_v56  ;;  %v8258_v41 = vand.u32 4294901760, %v7351_v9 }
 0x202   :  { %5450 = vmatprep.subr.bf16.mxu1 %v8326_v55  ;;  %5594 = vmatprep.subr.bf16.mxu0 %v8326_v55 }
 0x203   :  { %v7389_v57 = vpack.c.bf16 %v8258_v41, %v8259_v10 }
 0x208   :  { %4519 = vmatmul.mubr.msk.f32.vlgmr.msra.gmra.mrb[2].mxu1 %vm80_vm0, %v8358_v8  ;;  %4729 = vmatmul.mubr.msk.f32.vlgmr.msra.gmra.mrb[2].mxu0 %vm80_vm0, %v8358_v8 }
 0x209   :  { %5452 = vmatpush3.bf16.xpose.msra.mxu1 %v6372_v26  ;;  %5596 = vmatpush3.bf16.xpose.msra.mxu0 %v6378_v27  ;;  %v5964_v26 = vld [vmem:[%s8173_s0] sm:$0xff] }
 0x20a   :  { %5453 = vmatprep.subr.bf16.mxu1 %v8326_v55  ;;  %5597 = vmatprep.subr.bf16.mxu0 %v8326_v55  ;;  %v5965_v27 = vld [vmem:[%s8174_s1] sm:$0xff] }
 0x20b   :  { %4553 = vmatprep.mubr.msk.f32.mxu1 %vm6013_vm1, %v8337_v18  ;;  %4763 = vmatprep.mubr.msk.f32.mxu0 %vm6013_vm1, %v8337_v18 }
 0x211   :  { %5455 = vmatpush3.bf16.xpose.msra.mxu1 %v6423_v30  ;;  %5599 = vmatpush3.bf16.xpose.msra.mxu0 %v6429_v33  ;;  %v2183_v30 = vmul.f32 %v5965_v27, %v5964_v26  ;;  %v5966_v33 = vld [vmem:[%s8173_s0 + $0x8] sm:$0xff]  ;;  %v5983_v27 = vld [vmem:[%s8174_s1 + $0x30] sm:$0xff] }
 0x212   :  { %5456 = vmatprep.subr.bf16.mxu1 %v8326_v55  ;;  %5600 = vmatprep.subr.bf16.mxu0 %v8326_v55 }
 0x213   :  { %v7234_v51 = vsel %vm80_vm0, %v2183_v30, 0 }
 0x214   :  { %v2248_v25 = vand.u32 4294901760, %v7234_v51 }
 0x219   :  { %5458 = vmatpush3.bf16.xpose.msra.mxu1 %v6467_v32  ;;  %5602 = vmatpush3.bf16.xpose.msra.mxu0 %v6473_v43  ;;  %v5967_v32 = vld [vmem:[%s8174_s1 + $0x8] sm:$0xff] }
 0x21a   :  { %5459 = vmatprep.subr.bf16.mxu1 %v8326_v55  ;;  %5603 = vmatprep.subr.bf16.mxu0 %v8326_v55  ;;  %v2184_v43 = vmul.f32 %v5967_v32, %v5966_v33  ;;  %v5985_v32 = vld [vmem:[%s8174_s1 + $0x38] sm:$0xff] }
 0x21c   :  { %v7237_v38 = vsel %vm80_vm0, %v2184_v43, 0 }
 0x21d   :  { %v2251_v12 = vand.u32 4294901760, %v7237_v38 }
 0x21f   :  { %v7275_v63 = vpack.c.bf16 %v2251_v12, %v2248_v25 }
 0x221   :  { %5461 = vmatpush3.bf16.xpose.msra.mxu1 %v6511_v22  ;;  %5605 = vmatpush3.bf16.xpose.msra.mxu0 %v6517_v24  ;;  %v5968_v22 = vld [vmem:[%s8175_s2] sm:$0xff] }
 0x222   :  { %5462 = vmatprep.subr.bf16.mxu1 %v8326_v55  ;;  %5606 = vmatprep.subr.bf16.mxu0 %v8326_v55  ;;  %v2888_v24 = vmul.f32 %v5968_v22, %v5964_v26  ;;  %v5982_v26 = vld [vmem:[%s8173_s0 + $0x30] sm:$0xff] }
 0x223   :  { %v2189_v30 = vmul.f32 %v5983_v27, %v5982_v26  ;;  %v5986_v22 = vld [vmem:[%s8175_s2 + $0x30] sm:$0xff] }
 0x224   :  { %v7240_v53 = vsel %vm80_vm0, %v2888_v24, 0  ;;  %v2894_v24 = vmul.f32 %v5986_v22, %v5982_v26 }
 0x225   :  { %v2953_v49 = vand.u32 4294901760, %v7240_v53  ;;  %v7392_v62 = vsel %vm80_vm0, %v2189_v30, 0  ;;  %v7442_v30 = vsel %vm80_vm0, %v2191_v2, 0  ;;  %v2193_v2 = vmul.f32 %v5995_v42, %v5994_v58 }
 0x226   :  { %v8254_v22 = vand.u32 4294901760, %v7442_v30 }
 0x229   :  { %5464 = vmatpush3.bf16.xpose.msra.mxu1 %v6555_v11  ;;  %5608 = vmatpush3.bf16.xpose.msra.mxu0 %v8359_v6  ;;  %v5969_v11 = vld [vmem:[%s8175_s2 + $0x8] sm:$0xff]  ;;  %v5972_v6 = vld [vmem:[%s8173_s0 + $0x18] sm:$0xff] }
 0x22a   :  { %5465 = vmatprep.subr.bf16.mxu1 %v8326_v55  ;;  %5609 = vmatprep.subr.bf16.mxu0 %v8326_v55  ;;  %v2889_v54 = vmul.f32 %v5969_v11, %v5966_v33  ;;  %v5984_v33 = vld [vmem:[%s8173_s0 + $0x38] sm:$0xff] }
 0x22b   :  { %v2190_v43 = vmul.f32 %v5985_v32, %v5984_v33  ;;  %v5987_v11 = vld [vmem:[%s8175_s2 + $0x38] sm:$0xff]  ;;  %v7448_v32 = vsel %vm80_vm0, %v2896_v40, 0  ;;  %v2898_v40 = vmul.f32 %v5998_v44, %v5994_v58 }
 0x22c   :  { %v7243_v35 = vsel %vm80_vm0, %v2889_v54, 0  ;;  %v2895_v54 = vmul.f32 %v5987_v11, %v5984_v33  ;;  %v7445_v33 = vsel %vm80_vm0, %v2192_v23, 0  ;;  %v8252_v11 = vand.u32 4294901760, %v7448_v32 }
 0x22d   :  { %v2956_v3 = vand.u32 4294901760, %v7243_v35  ;;  %v2194_v23 = vmul.f32 %v5997_v16, %v5996_v52 }
 0x22f   :  { %v7281_v45 = vpack.c.bf16 %v2956_v3, %v2953_v49  ;;  %v7495_v58 = vsel %vm80_vm0, %v2194_v23, 0  ;;  %v6000_v23 = vld [vmem:[%s8173_s0 + $0x60] sm:$0xff] }
 0x231   :  { %5467 = vmatpush3.bf16.xpose.msra.mxu1 %v8360_v20  ;;  %5611 = vmatpush3.bf16.xpose.msra.mxu0 %v8361_v47  ;;  %v5973_v20 = vld [vmem:[%s8174_s1 + $0x18] sm:$0xff] }
 0x232   :  { %5468 = vmatprep.subr.bf16.mxu1 %v8326_v55  ;;  %5612 = vmatprep.subr.bf16.mxu0 %v8326_v55  ;;  %v2186_v47 = vmul.f32 %v5973_v20, %v5972_v6  ;;  %v7398_v20 = vsel %vm80_vm0, %v2894_v24, 0  ;;  %v8253_v24 = vand.u32 4294901760, %v7445_v33 }
 0x234   :  { %v7287_v13 = vsel %vm80_vm0, %v2186_v47, 0  ;;  %v7401_v47 = vsel %vm80_vm0, %v2895_v54, 0  ;;  %v7483_v42 = vpack.c.bf16 %v8253_v24, %v8254_v22  ;;  %v6002_v24 = vld [vmem:[%s8173_s0 + $0x68] sm:$0xff] }
 0x235   :  { %v8268_v0 = vand.u32 4294901760, %v7287_v13  ;;  %v6003_v22 = vld [vmem:[%s8174_s1 + $0x68] sm:$0xff] }
 0x236   :  { %8396 = vst [vmem:[#allocation5_spill] sm:$0xff] %v7483_v42 }
 0x237   :  { %v7333_v37 = vpack.c.bf16 %v8268_v0, %v8269_v19  ;;  %v7582_v19 = vsub.f32 %v7234_v51, %v2248_v25 }
 0x239   :  { %5470 = vmatpush3.bf16.xpose.msra.mxu1 %v8362_v1  ;;  %5614 = vmatpush3.bf16.xpose.msra.mxu0 %v8363_v14  ;;  %v5974_v1 = vld [vmem:[%s8175_s2 + $0x10] sm:$0xff] }
 0x23a   :  { %5471 = vmatprep.subr.bf16.mxu1 %v8326_v55  ;;  %5615 = vmatprep.subr.bf16.mxu0 %v8326_v55  ;;  %v2890_v14 = vmul.f32 %v5974_v1, %v5970_v61  ;;  %v7383_v61 = vpack.c.bf16 %v8260_v29, %v8265_v50  ;;  %v8257_v1 = vand.u32 4294901760, %v7392_v62 }
 0x23c   :  { %v7290_v5 = vsel %vm80_vm0, %v2890_v14, 0 }
 0x23d   :  { %v8267_v28 = vand.u32 4294901760, %v7290_v5 }
 0x241   :  { %5473 = vmatpush3.bf16.xpose.msra.mxu1 %v8364_v15  ;;  %5617 = vmatpush3.bf16.xpose.msra.mxu0 %v8365_v46  ;;  %v5975_v15 = vld [vmem:[%s8175_s2 + $0x18] sm:$0xff] }
 0x242   :  { %5618 = vmatprep.subr.bf16.mxu1 %v8326_v55  ;;  %5762 = vmatprep.subr.bf16.mxu0 %v8326_v55  ;;  %v2891_v46 = vmul.f32 %v5975_v15, %v5972_v6  ;;  %v7395_v6 = vsel %vm80_vm0, %v2190_v43, 0  ;;  %v8255_v15 = vand.u32 4294901760, %v7398_v20  ;;  %v7451_v43 = vsel %vm80_vm0, %v2897_v59, 0 }
 0x243   :  { %v8256_v14 = vand.u32 4294901760, %v7395_v6  ;;  %v8251_v54 = vand.u32 4294901760, %v7451_v43  ;;  %v2899_v59 = vmul.f32 %v5999_v36, %v5996_v52  ;;  %v7498_v52 = vsel %vm80_vm0, %v2898_v40, 0  ;;  %v6001_v40 = vld [vmem:[%s8174_s1 + $0x60] sm:$0xff] }
 0x244   :  { %v7293_v31 = vsel %vm80_vm0, %v2891_v46, 0  ;;  %v8250_v46 = vand.u32 4294901760, %v7401_v47 }
 0x245   :  { %v8266_v21 = vand.u32 4294901760, %v7293_v31  ;;  %v7433_v26 = vpack.c.bf16 %v8256_v14, %v8257_v1  ;;  %v7489_v16 = vpack.c.bf16 %v8251_v54, %v8252_v11  ;;  %v7501_v44 = vsel %vm80_vm0, %v2899_v59, 0  ;;  %v6004_v14 = vld [vmem:[%s8175_s2 + $0x60] sm:$0xff] }
 0x246   :  { %v7439_v27 = vpack.c.bf16 %v8250_v46, %v8255_v15  ;;  %v7492_v46 = vsel %vm80_vm0, %v2193_v2, 0  ;;  %v8263_v54 = vand.u32 4294901760, %v7495_v58  ;;  %v8262_v2 = vand.u32 4294901760, %v7498_v52 }
 0x247   :  { %v7339_v7 = vpack.c.bf16 %v8266_v21, %v8267_v28  ;;  %8397 = vst [vmem:[#allocation6_spill] sm:$0xff] %v7489_v16  ;;  %v8264_v36 = vand.u32 4294901760, %v7492_v46  ;;  %v8261_v11 = vand.u32 4294901760, %v7501_v44  ;;  %v2195_v59 = vmul.f32 %v6001_v40, %v6000_v23  ;;  %v6005_v40 = vld [vmem:[%s8175_s2 + $0x68] sm:$0xff]  ;;  %v6010_v21 = vld [vmem:[%s8175_s2 + $0x70] sm:$0xff] }
 0x248   :  { %4554 = vmatmul.mubr.msk.f32.vlgmr.msra.gmra.mrb[2].mxu1 %vm80_vm0, %v8358_v8  ;;  %4764 = vmatmul.mubr.msk.f32.vlgmr.msra.gmra.mrb[2].mxu0 %vm80_vm0, %v8358_v8  ;;  %8395 = vst [vmem:[#allocation4_spill] sm:$0xff] %v7439_v27  ;;  %v2196_v15 = vmul.f32 %v6003_v22, %v6002_v24  ;;  %v2900_v1 = vmul.f32 %v6004_v14, %v6000_v23 }
 0x249   :  { %5620 = vmatpush3.bf16.xpose.msra.mxu1 %v7275_v63  ;;  %5764 = vmatpush3.bf16.xpose.msra.mxu0 %v7281_v45  ;;  %v2901_v41 = vmul.f32 %v6005_v40, %v6002_v24  ;;  %v7533_v10 = vpack.c.bf16 %v8263_v54, %v8264_v36  ;;  %v7539_v22 = vpack.c.bf16 %v8261_v11, %v8262_v2  ;;  %v7542_v29 = vsel %vm80_vm0, %v2195_v59, 0  ;;  %v6008_v54 = vld [vmem:[%s8173_s0 + $0x78] sm:$0xff] }
 0x24a   :  { %5621 = vmatprep.subr.bf16.mxu1 %v8326_v55  ;;  %5765 = vmatprep.subr.bf16.mxu0 %v8326_v55  ;;  %v7545_v14 = vsel %vm80_vm0, %v2196_v15, 0  ;;  %v7548_v24 = vsel %vm80_vm0, %v2900_v1, 0  ;;  %v8272_v40 = vand.u32 4294901760, %v7542_v29  ;;  %v6006_v1 = vld [vmem:[%s8173_s0 + $0x70] sm:$0xff]  ;;  %v6009_v36 = vld [vmem:[%s8174_s1 + $0x78] sm:$0xff]  ;;  %v7587_v2 = vsub.f32 %v7237_v38, %v2251_v12 }
 0x24b   :  { %4798 = vmatprep.mubr.msk.f32.mxu1 %vm6013_vm1, %v8337_v18  ;;  %5008 = vmatprep.mubr.msk.f32.mxu0 %vm6013_vm1, %v8337_v18  ;;  %8398 = vst [vmem:[#allocation7_spill] sm:$0xff] %v7533_v10  ;;  %8399 = vst [vmem:[#allocation8_spill] sm:$0xff] %v7539_v22  ;;  %v7551_v23 = vsel %vm80_vm0, %v2901_v41, 0  ;;  %v8271_v11 = vand.u32 4294901760, %v7545_v14  ;;  %v8270_v59 = vand.u32 4294901760, %v7548_v24  ;;  %v6007_v41 = vld [vmem:[%s8174_s1 + $0x70] sm:$0xff]  ;;  %v2198_v50 = vmul.f32 %v6009_v36, %v6008_v54 }
 0x24c   :  { %v2197_v15 = vmul.f32 %v6007_v41, %v6006_v1  ;;  %v2902_v28 = vmul.f32 %v6010_v21, %v6006_v1  ;;  %v6011_v41 = vld [vmem:[%s8175_s2 + $0x78] sm:$0xff]  ;;  %v7592_v36 = vsub.f32 %v7240_v53, %v2953_v49  ;;  %v7597_v21 = vsub.f32 %v7243_v35, %v2956_v3 }
 0x24d   :  { %v2903_v0 = vmul.f32 %v6011_v41, %v6008_v54  ;;  %v7603_v51 = vpack.c.bf16 %v8271_v11, %v8272_v40  ;;  %v8401_v38 = vand.u32 4294901760, %v7551_v23  ;;  %v7615_v12 = vsel %vm80_vm0, %v2198_v50, 0 }
 0x24e   :  { %v7612_v53 = vsel %vm80_vm0, %v2197_v15, 0  ;;  %v7618_v35 = vsel %vm80_vm0, %v2902_v28, 0  ;;  %v8273_v3 = vand.u32 4294901760, %v7582_v19  ;;  %v8274_v54 = vand.u32 4294901760, %v7587_v2 }
 0x24f   :  { %8400 = vst [vmem:[#allocation9_spill] sm:$0xff] %v7603_v51  ;;  %v7609_v25 = vpack.c.bf16 %v8401_v38, %v8270_v59  ;;  %v7621_v49 = vsel %vm80_vm0, %v2903_v0, 0  ;;  %v8276_v1 = vand.u32 4294901760, %v7592_v36  ;;  %v8277_v41 = vand.u32 4294901760, %v7597_v21 }
 0x250   :  { %v8284_v50 = vand.u32 4294901760, %v7612_v53  ;;  %v8403_v38 = vand.u32 4294901760, %v7284_v60  ;;  %v8404_v11 = vand.u32 4294901760, %v7287_v13  ;;  %v2342_v15 = vsub.f32 %v7582_v19, %v8273_v3 }
 0x251   :  { %5623 = vmatpush3.bf16.xpose.msra.mxu1 %v7333_v37  ;;  %5767 = vmatpush3.bf16.xpose.msra.mxu0 %v7339_v7  ;;  %8402 = vst [vmem:[#allocation10_spill] sm:$0xff] %v7609_v25  ;;  %v2349_v0 = vsub.f32 %v7587_v2, %v8274_v54  ;;  %v3047_v28 = vsub.f32 %v7592_v36, %v8276_v1  ;;  %v8407_v54 = vand.u32 4294901760, %v7615_v12  ;;  %v8409_v1 = vand.u32 4294901760, %v7618_v35 }
 0x252   :  { %5624 = vmatprep.subr.bf16.mxu1 %v8326_v55  ;;  %5768 = vmatprep.subr.bf16.mxu0 %v8326_v55  ;;  %v7638_v59 = vsub.f32 %v7284_v60, %v8403_v38  ;;  %v7643_v40 = vsub.f32 %v7287_v13, %v8404_v11  ;;  %v3054_v60 = vsub.f32 %v7597_v21, %v8277_v41  ;;  %v8405_v38 = vand.u32 4294901760, %v7290_v5 }
 0x253   :  { %v8406_v11 = vand.u32 4294901760, %v7293_v31  ;;  %v7671_v17 = vpack.c.bf16 %v8407_v54, %v8284_v50  ;;  %v8410_v41 = vand.u32 4294901760, %v7621_v49  ;;  %v8415_v50 = vand.u32 4294901760, %v7351_v9 }
 0x254   :  { %v7660_v13 = vsub.f32 %v7290_v5, %v8405_v38  ;;  %v2350_v5 = vand.u32 4294901760, %v2349_v0  ;;  %v3048_v38 = vand.u32 4294901760, %v3047_v28  ;;  %v8413_v28 = vand.u32 4294901760, %v7345_v48 }
 0x255   :  { %v7665_v3 = vsub.f32 %v7293_v31, %v8406_v11  ;;  %8408 = vst [vmem:[#allocation11_spill] sm:$0xff] %v7671_v17  ;;  %v8414_v0 = vand.u32 4294901760, %v7348_v56  ;;  %v7705_v54 = vsub.f32 %v7351_v9, %v8415_v50  ;;  %v8420_v9 = vld [vmem:[#allocation3_spill] sm:$0xff] }
 0x259   :  { %5626 = vmatpush3.bf16.xpose.msra.mxu1 %v7383_v61  ;;  %5770 = vmatpush3.bf16.xpose.msra.mxu0 %v7389_v57 }
 0x25a   :  { %5627 = vmatprep.subr.bf16.mxu1 %v8326_v55  ;;  %5771 = vmatprep.subr.bf16.mxu0 %v8326_v55 }
 0x261   :  { %5629 = vmatpush3.bf16.xpose.msra.mxu1 %v7433_v26  ;;  %5773 = vmatpush3.bf16.xpose.msra.mxu0 %v7439_v27 }
 0x262   :  { %5630 = vmatprep.subr.bf16.mxu1 %v8326_v55  ;;  %5774 = vmatprep.subr.bf16.mxu0 %v8326_v55 }
 0x269   :  { %5632 = vmatpush3.bf16.xpose.msra.mxu1 %v7483_v42  ;;  %5776 = vmatpush3.bf16.xpose.msra.mxu0 %v7489_v16 }
 0x26a   :  { %5633 = vmatprep.subr.bf16.mxu1 %v8326_v55  ;;  %5777 = vmatprep.subr.bf16.mxu0 %v8326_v55 }
 0x271   :  { %5635 = vmatpush3.bf16.xpose.msra.mxu1 %v7533_v10  ;;  %5779 = vmatpush3.bf16.xpose.msra.mxu0 %v7539_v22  ;;  %v3055_v22 = vand.u32 4294901760, %v3054_v60  ;;  %v7700_v60 = vsub.f32 %v7348_v56, %v8414_v0  ;;  %v8419_v0 = vand.u32 4294901760, %v7665_v3 }
 0x272   :  { %5636 = vmatprep.subr.bf16.mxu1 %v8326_v55  ;;  %5780 = vmatprep.subr.bf16.mxu0 %v8326_v55 }
 0x273   :  { %v5787_v31 = vpack.c.bf16 %v3055_v22, %v3048_v38 }
 0x279   :  { %5638 = vmatpush3.bf16.xpose.msra.mxu1 %v7603_v51  ;;  %5782 = vmatpush3.bf16.xpose.msra.mxu0 %v7609_v25  ;;  %v7677_v25 = vpack.c.bf16 %v8410_v41, %v8409_v1  ;;  %v2343_v51 = vand.u32 4294901760, %v2342_v15  ;;  %v8412_v1 = vand.u32 4294901760, %v7342_v34  ;;  %v7695_v15 = vsub.f32 %v7345_v48, %v8413_v28 }
 0x27a   :  { %5639 = vmatprep.subr.bf16.mxu1 %v8326_v55  ;;  %5783 = vmatprep.subr.bf16.mxu0 %v8326_v55  ;;  %v8418_v28 = vand.u32 4294901760, %v7660_v13 }
 0x27b   :  { %8411 = vst [vmem:[#allocation12_spill] sm:$0xff] %v7677_v25  ;;  %v7690_v41 = vsub.f32 %v7342_v34, %v8412_v1  ;;  %v5643_v11 = vpack.c.bf16 %v2350_v5, %v2343_v51  ;;  %v8416_v34 = vand.u32 4294901760, %v7638_v59  ;;  %v8422_v51 = vand.u32 4294901760, %v7395_v6 }
 0x27c   :  { %v3061_v56 = vsub.f32 %v7660_v13, %v8418_v28 }
 0x27d   :  { %v2356_v1 = vsub.f32 %v7638_v59, %v8416_v34  ;;  %v8289_v22 = vand.u32 4294901760, %v7690_v41  ;;  %v7735_v50 = vsub.f32 %v7395_v6, %v8422_v51  ;;  %v8426_v51 = vand.u32 4294901760, %v7401_v47 }
 0x27e   :  { %v3062_v34 = vand.u32 4294901760, %v3061_v56 }
 0x27f   :  { %v2357_v5 = vand.u32 4294901760, %v2356_v1  ;;  %v8303_v27 = vand.u32 4294901760, %v7735_v50 }
 0x281   :  { %5641 = vmatpush3.bf16.xpose.msra.mxu1 %v7671_v17  ;;  %5785 = vmatpush3.bf16.xpose.msra.mxu0 %v7677_v25  ;;  %v8417_v25 = vand.u32 4294901760, %v7643_v40  ;;  %v3068_v17 = vsub.f32 %v7665_v3, %v8419_v0  ;;  %v8421_v0 = vand.u32 4294901760, %v7392_v62 }
 0x282   :  { %5642 = vmatprep.subr.bf16.mxu1 %v8326_v55  ;;  %5786 = vmatprep.subr.bf16.mxu0 %v8326_v55 }
 0x283   :  { %v2363_v48 = vsub.f32 %v7643_v40, %v8417_v25  ;;  %v8296_v25 = vand.u32 4294901760, %v7705_v54  ;;  %v3069_v28 = vand.u32 4294901760, %v3068_v17  ;;  %v2370_v17 = vsub.f32 %v7690_v41, %v8289_v22 }
 0x285   :  { %v2364_v38 = vand.u32 4294901760, %v2363_v48  ;;  %v3082_v6 = vsub.f32 %v7705_v54, %v8296_v25  ;;  %v8425_v48 = vand.u32 4294901760, %v7398_v20  ;;  %v2371_v10 = vand.u32 4294901760, %v2370_v17 }
 0x286   :  { %v8430_v17 = vand.u32 4294901760, %v7451_v43 }
 0x287   :  { %v7756_v56 = vsub.f32 %v7398_v20, %v8425_v48  ;;  %v5646_v22 = vpack.c.bf16 %v2364_v38, %v2357_v5 }
 0x288   :  { %4799 = vmatmul.mubr.f32.vlgmr.msra.gmra.mrb[4].mxu1 %v8420_v9  ;;  %5009 = vmatmul.mubr.f32.vlgmr.msra.gmra.mrb[4].mxu0 %v8420_v9  ;;  %v7730_v9 = vsub.f32 %v7392_v62, %v8421_v0  ;;  %v7761_v0 = vsub.f32 %v7401_v47, %v8426_v51  ;;  %v8427_v47 = vand.u32 4294901760, %v7442_v30 }
 0x289   :  { %5644 = vmatpush3.bf16.xpose.msra.mxu1 %v5643_v11  ;;  %5788 = vmatpush3.bf16.xpose.msra.mxu0 %v5787_v31  ;;  %v8423_v31 = vand.u32 4294901760, %v7695_v15  ;;  %v8424_v11 = vand.u32 4294901760, %v7700_v60  ;;  %v8300_v20 = vand.u32 4294901760, %v7756_v56 }
 0x28a   :  { %5645 = vmatprep.subr.bf16.mxu1 %v8326_v55  ;;  %5789 = vmatprep.subr.bf16.mxu0 %v8326_v55  ;;  %v8306_v25 = vand.u32 4294901760, %v7730_v9  ;;  %v8299_v48 = vand.u32 4294901760, %v7761_v0  ;;  %v7772_v5 = vsub.f32 %v7442_v30, %v8427_v47 }
 0x28b   :  { %4833 = vmatprep.mubr.msk.f32.mxu1 %vm6013_vm1, %v8337_v18  ;;  %5043 = vmatprep.mubr.msk.f32.mxu0 %vm6013_vm1, %v8337_v18  ;;  %v2377_v62 = vsub.f32 %v7695_v15, %v8423_v31  ;;  %v3075_v1 = vsub.f32 %v7700_v60, %v8424_v11  ;;  %v5790_v31 = vpack.c.bf16 %v3069_v28, %v3062_v34  ;;  %v3083_v11 = vand.u32 4294901760, %v3082_v6 }
 0x28c   :  { %v8429_v34 = vand.u32 4294901760, %v7448_v32  ;;  %v2384_v30 = vsub.f32 %v7730_v9, %v8306_v25  ;;  %v3096_v51 = vsub.f32 %v7761_v0, %v8299_v48  ;;  %v8432_v48 = vand.u32 4294901760, %v7495_v58 }
 0x28d   :  { %v2378_v16 = vand.u32 4294901760, %v2377_v62  ;;  %v3076_v42 = vand.u32 4294901760, %v3075_v1  ;;  %v7787_v62 = vsub.f32 %v7451_v43, %v8430_v17  ;;  %v8302_v43 = vand.u32 4294901760, %v7772_v5 }
 0x28e   :  { %v7782_v28 = vsub.f32 %v7448_v32, %v8429_v34  ;;  %v3089_v32 = vsub.f32 %v7756_v56, %v8300_v20  ;;  %v8431_v34 = vand.u32 4294901760, %v7492_v46  ;;  %v7815_v20 = vsub.f32 %v7495_v58, %v8432_v48 }
 0x28f   :  { %v5649_v1 = vpack.c.bf16 %v2378_v16, %v2371_v10  ;;  %v5793_v6 = vpack.c.bf16 %v3083_v11, %v3076_v42  ;;  %v8305_v16 = vand.u32 4294901760, %v7787_v62  ;;  %v8434_v48 = vand.u32 4294901760, %v7501_v44 }
 0x290   :  { %v8304_v42 = vand.u32 4294901760, %v7782_v28  ;;  %v3090_v47 = vand.u32 4294901760, %v3089_v32  ;;  %v7810_v17 = vsub.f32 %v7492_v46, %v8431_v34  ;;  %v8311_v25 = vand.u32 4294901760, %v7815_v20 }
 0x291   :  { %5647 = vmatpush3.bf16.xpose.msra.mxu1 %v5646_v22  ;;  %5791 = vmatpush3.bf16.xpose.msra.mxu0 %v5790_v31  ;;  %v8428_v22 = vand.u32 4294901760, %v7445_v33  ;;  %v2385_v31 = vand.u32 4294901760, %v2384_v30  ;;  %v3110_v46 = vsub.f32 %v7787_v62, %v8305_v16  ;;  %v7837_v32 = vsub.f32 %v7501_v44, %v8434_v48 }
 0x292   :  { %5648 = vmatprep.subr.bf16.mxu1 %v8326_v55  ;;  %5792 = vmatprep.subr.bf16.mxu0 %v8326_v55  ;;  %v3103_v30 = vsub.f32 %v7782_v28, %v8304_v42  ;;  %v8314_v16 = vand.u32 4294901760, %v7810_v17  ;;  %v8435_v44 = vand.u32 4294901760, %v7542_v29 }
 0x293   :  { %v7777_v38 = vsub.f32 %v7445_v33, %v8428_v22  ;;  %v2391_v33 = vsub.f32 %v7735_v50, %v8303_v27  ;;  %v3097_v22 = vand.u32 4294901760, %v3096_v51  ;;  %v3111_v42 = vand.u32 4294901760, %v3110_v46 }
 0x294   :  { %v3104_v27 = vand.u32 4294901760, %v3103_v30 }
 0x295   :  { %v8301_v10 = vand.u32 4294901760, %v7777_v38  ;;  %v2392_v11 = vand.u32 4294901760, %v2391_v33  ;;  %v8433_v33 = vand.u32 4294901760, %v7498_v52  ;;  %v5796_v34 = vpack.c.bf16 %v3097_v22, %v3090_v47 }
 0x296   :  { %v8437_v22 = vand.u32 4294901760, %v7548_v24  ;;  %v5799_v48 = vpack.c.bf16 %v3111_v42, %v3104_v27 }
 0x297   :  { %v7832_v58 = vsub.f32 %v7498_v52, %v8433_v33  ;;  %v5652_v51 = vpack.c.bf16 %v2392_v11, %v2385_v31  ;;  %v8307_v33 = vand.u32 4294901760, %v7837_v32  ;;  %v7848_v31 = vsub.f32 %v7542_v29, %v8435_v44 }
 0x298   :  { %v8436_v11 = vand.u32 4294901760, %v7545_v14  ;;  %v2412_v29 = vsub.f32 %v7810_v17, %v8314_v16 }
 0x299   :  { %5650 = vmatpush3.bf16.xpose.msra.mxu1 %v5649_v1  ;;  %5794 = vmatpush3.bf16.xpose.msra.mxu0 %v5793_v6  ;;  %v2398_v1 = vsub.f32 %v7772_v5, %v8302_v43  ;;  %v2405_v6 = vsub.f32 %v7777_v38, %v8301_v10  ;;  %v8308_v52 = vand.u32 4294901760, %v7832_v58 }
 0x29a   :  { %5651 = vmatprep.subr.bf16.mxu1 %v8326_v55  ;;  %5795 = vmatprep.subr.bf16.mxu0 %v8326_v55  ;;  %v7853_v47 = vsub.f32 %v7545_v14, %v8436_v11  ;;  %v2419_v14 = vsub.f32 %v7815_v20, %v8311_v25  ;;  %v2413_v42 = vand.u32 4294901760, %v2412_v29 }
 0x29b   :  { %v2399_v10 = vand.u32 4294901760, %v2398_v1  ;;  %v2406_v43 = vand.u32 4294901760, %v2405_v6  ;;  %v7858_v1 = vsub.f32 %v7548_v24, %v8437_v22  ;;  %v8438_v6 = vand.u32 4294901760, %v7551_v23 }
 0x29c   :  { %v3117_v24 = vsub.f32 %v7832_v58, %v8308_v52  ;;  %v8309_v27 = vand.u32 4294901760, %v7853_v47  ;;  %v8439_v22 = vand.u32 4294901760, %v7612_v53 }
 0x29d   :  { %v7863_v30 = vsub.f32 %v7551_v23, %v8438_v6  ;;  %v5655_v46 = vpack.c.bf16 %v2406_v43, %v2399_v10  ;;  %v8310_v23 = vand.u32 4294901760, %v7848_v31  ;;  %v8312_v43 = vand.u32 4294901760, %v7858_v1 }
 0x29e   :  { %v3118_v44 = vand.u32 4294901760, %v3117_v24  ;;  %v7886_v6 = vsub.f32 %v7612_v53, %v8439_v22 }
 0x29f   :  { %v8313_v10 = vand.u32 4294901760, %v7863_v30  ;;  %v3131_v29 = vsub.f32 %v7858_v1, %v8312_v43 }
 0x2a1   :  { %5653 = vmatpush3.bf16.xpose.msra.mxu1 %v5652_v51  ;;  %5797 = vmatpush3.bf16.xpose.msra.mxu0 %v5796_v34  ;;  %v3124_v51 = vsub.f32 %v7837_v32, %v8307_v33  ;;  %v2420_v34 = vand.u32 4294901760, %v2419_v14  ;;  %v8440_v33 = vand.u32 4294901760, %v7615_v12  ;;  %v3138_v53 = vsub.f32 %v7863_v30, %v8313_v10 }
 0x2a2   :  { %5654 = vmatprep.subr.bf16.mxu1 %v8326_v55  ;;  %5798 = vmatprep.subr.bf16.mxu0 %v8326_v55  ;;  %v8441_v14 = vand.u32 4294901760, %v7618_v35  ;;  %v3132_v25 = vand.u32 4294901760, %v3131_v29  ;;  %v2439_v10 = vand.u32 4294901760, %v7886_v6 }
 0x2a3   :  { %v3125_v11 = vand.u32 4294901760, %v3124_v51  ;;  %v7891_v52 = vsub.f32 %v7615_v12, %v8440_v33  ;;  %v8442_v33 = vand.u32 4294901760, %v7621_v49  ;;  %v5658_v51 = vpack.c.bf16 %v2420_v34, %v2413_v42 }
 0x2a4   :  { %v7908_v12 = vsub.f32 %v7618_v35, %v8441_v14  ;;  %v3139_v43 = vand.u32 4294901760, %v3138_v53  ;;  %v2440_v34 = vsub.f32 %v7886_v6, %v2439_v10  ;;  %v5667_v53 = vpack.c.bf16 %v7587_v2, %v7582_v19 }
 0x2a5   :  { %v7913_v24 = vsub.f32 %v7621_v49, %v8442_v33  ;;  %v5802_v22 = vpack.c.bf16 %v3125_v11, %v3118_v44  ;;  %v2446_v16 = vand.u32 4294901760, %v7891_v52  ;;  %v5811_v33 = vpack.c.bf16 %v7597_v21, %v7592_v36 }
 0x2a6   :  { %v3144_v35 = vand.u32 4294901760, %v7908_v12  ;;  %v5805_v42 = vpack.c.bf16 %v3139_v43, %v3132_v25 }
 0x2a7   :  { %v3151_v14 = vand.u32 4294901760, %v7913_v24  ;;  %v2447_v44 = vsub.f32 %v7891_v52, %v2446_v16 }
 0x2a8   :  { %v3145_v11 = vsub.f32 %v7908_v12, %v3144_v35 }
 0x2a9   :  { %5656 = vmatpush3.bf16.xpose.msra.mxu1 %v5655_v46  ;;  %5800 = vmatpush3.bf16.xpose.msra.mxu0 %v5799_v48  ;;  %v2426_v46 = vsub.f32 %v7848_v31, %v8310_v23  ;;  %v2433_v48 = vsub.f32 %v7853_v47, %v8309_v27  ;;  %v2448_v25 = vand.u32 4294901760, %v2447_v44  ;;  %v5820_v44 = vpack.c.bf16 %v7761_v0, %v7756_v56 }
 0x2aa   :  { %5657 = vmatprep.subr.bf16.mxu1 %v8326_v55  ;;  %5801 = vmatprep.subr.bf16.mxu0 %v8326_v55 }
 0x2ab   :  { %v2427_v27 = vand.u32 4294901760, %v2426_v46  ;;  %v2434_v23 = vand.u32 4294901760, %v2433_v48  ;;  %v3152_v46 = vsub.f32 %v7913_v24, %v3151_v14 }
 0x2ad   :  { %v5661_v49 = vpack.c.bf16 %v2434_v23, %v2427_v27  ;;  %v2441_v23 = vand.u32 4294901760, %v2440_v34  ;;  %v3146_v27 = vand.u32 4294901760, %v3145_v11  ;;  %v3153_v43 = vand.u32 4294901760, %v3152_v46 }
 0x2ae   :  { %v5676_v34 = vpack.c.bf16 %v7735_v50, %v7730_v9  ;;  %v5679_v11 = vpack.c.bf16 %v7777_v38, %v7772_v5  ;;  %v5823_v46 = vpack.c.bf16 %v7787_v62, %v7782_v28 }
 0x2af   :  { %v5664_v48 = vpack.c.bf16 %v2448_v25, %v2441_v23  ;;  %v5808_v29 = vpack.c.bf16 %v3153_v43, %v3146_v27  ;;  %v5682_v23 = vpack.c.bf16 %v7815_v20, %v7810_v17  ;;  %v5826_v25 = vpack.c.bf16 %v7837_v32, %v7832_v58 }
 0x2b0   :  { %v5685_v27 = vpack.c.bf16 %v7853_v47, %v7848_v31  ;;  %v5829_v43 = vpack.c.bf16 %v7863_v30, %v7858_v1 }
 0x2b1   :  { %5659 = vmatpush3.bf16.xpose.msra.mxu1 %v5658_v51  ;;  %5803 = vmatpush3.bf16.xpose.msra.mxu0 %v5802_v22  ;;  %v5670_v51 = vpack.c.bf16 %v7643_v40, %v7638_v59  ;;  %v5814_v22 = vpack.c.bf16 %v7665_v3, %v7660_v13 }
 0x2b2   :  { %5660 = vmatprep.subr.bf16.mxu1 %v8326_v55  ;;  %5804 = vmatprep.subr.bf16.mxu0 %v8326_v55 }
 0x2b9   :  { %5662 = vmatpush3.bf16.xpose.msra.mxu1 %v5661_v49  ;;  %5806 = vmatpush3.bf16.xpose.msra.mxu0 %v5805_v42  ;;  %v5673_v49 = vpack.c.bf16 %v7695_v15, %v7690_v41  ;;  %v5817_v42 = vpack.c.bf16 %v7705_v54, %v7700_v60 }
 0x2ba   :  { %5663 = vmatprep.subr.bf16.mxu1 %v8326_v55  ;;  %5807 = vmatprep.subr.bf16.mxu0 %v8326_v55 }
 0x2c1   :  { %5665 = vmatpush3.bf16.xpose.msra.mxu1 %v5664_v48  ;;  %5809 = vmatpush3.bf16.xpose.msra.mxu0 %v5808_v29  ;;  %v5688_v48 = vpack.c.bf16 %v7891_v52, %v7886_v6  ;;  %v5832_v29 = vpack.c.bf16 %v7913_v24, %v7908_v12 }
 0x2c2   :  { %5666 = vmatprep.subr.bf16.mxu1 %v8326_v55  ;;  %5810 = vmatprep.subr.bf16.mxu0 %v8326_v55 }
 0x2c8   :  { %4834 = vmatmul.mubr.msk.f32.vlgmr.msra.gmra.mrb[4].mxu1 %vm80_vm0, %v8358_v8  ;;  %5044 = vmatmul.mubr.msk.f32.vlgmr.msra.gmra.mrb[4].mxu0 %vm80_vm0, %v8358_v8 }
 0x2c9   :  { %5668 = vmatpush3.bf16.xpose.msra.mxu1 %v5667_v53  ;;  %5812 = vmatpush3.bf16.xpose.msra.mxu0 %v5811_v33 }
 0x2ca   :  { %5669 = vmatprep.subr.bf16.mxu1 %v8326_v55  ;;  %5813 = vmatprep.subr.bf16.mxu0 %v8326_v55 }
 0x2cb   :  { %4868 = vmatprep.mubr.msk.f32.mxu1 %vm6013_vm1, %v8337_v18  ;;  %5078 = vmatprep.mubr.msk.f32.mxu0 %vm6013_vm1, %v8337_v18 }
 0x2d1   :  { %5671 = vmatpush3.bf16.xpose.msra.mxu1 %v5670_v51  ;;  %5815 = vmatpush3.bf16.xpose.msra.mxu0 %v5814_v22 }
 0x2d2   :  { %5672 = vmatprep.subr.bf16.mxu1 %v8326_v55  ;;  %5816 = vmatprep.subr.bf16.mxu0 %v8326_v55 }
 0x2d9   :  { %5674 = vmatpush3.bf16.xpose.msra.mxu1 %v5673_v49  ;;  %5818 = vmatpush3.bf16.xpose.msra.mxu0 %v5817_v42  ;;  %v8443_v42 = vld [vmem:[#allocation4_spill] sm:$0xff] }
 0x2da   :  { %5675 = vmatprep.subr.bf16.mxu1 %v8326_v55  ;;  %5819 = vmatprep.subr.bf16.mxu0 %v8326_v55 }
 0x2e1   :  { %5677 = vmatpush3.bf16.xpose.msra.mxu1 %v5676_v34  ;;  %5821 = vmatpush3.bf16.xpose.msra.mxu0 %v5820_v44  ;;  %v8444_v34 = vld [vmem:[#allocation5_spill] sm:$0xff]  ;;  %v8445_v44 = vld [vmem:[#allocation6_spill] sm:$0xff] }
 0x2e2   :  { %5678 = vmatprep.subr.bf16.mxu1 %v8326_v55  ;;  %5822 = vmatprep.subr.bf16.mxu0 %v8326_v55 }
 0x2e9   :  { %5680 = vmatpush3.bf16.xpose.msra.mxu1 %v5679_v11  ;;  %5824 = vmatpush3.bf16.xpose.msra.mxu0 %v5823_v46  ;;  %v8447_v11 = vld [vmem:[#allocation8_spill] sm:$0xff]  ;;  %v8448_v46 = vld [vmem:[#allocation9_spill] sm:$0xff] }
 0x2ea   :  { %5681 = vmatprep.subr.bf16.mxu1 %v8326_v55  ;;  %5825 = vmatprep.subr.bf16.mxu0 %v8326_v55 }
 0x2f1   :  { %5683 = vmatpush3.bf16.xpose.msra.mxu1 %v5682_v23  ;;  %5827 = vmatpush3.bf16.xpose.msra.mxu0 %v5826_v25  ;;  %v8449_v23 = vld [vmem:[#allocation10_spill] sm:$0xff]  ;;  %v8450_v25 = vld [vmem:[#allocation11_spill] sm:$0xff] }
 0x2f2   :  { %5684 = vmatprep.subr.bf16.mxu1 %v8326_v55  ;;  %5828 = vmatprep.subr.bf16.mxu0 %v8326_v55 }
 0x2f9   :  { %5686 = vmatpush3.bf16.xpose.msra.mxu1 %v5685_v27  ;;  %5830 = vmatpush3.bf16.xpose.msra.mxu0 %v5829_v43  ;;  %v8451_v27 = vld [vmem:[#allocation12_spill] sm:$0xff]  ;;  %v8452_v43 = vand.u32 4294901760, %v7582_v19  ;;  %v8457_v19 = vand.u32 4294901760, %v7638_v59  ;;  %v8463_v59 = vand.u32 4294901760, %v7700_v60  ;;  %v8470_v60 = vand.u32 4294901760, %v7777_v38 }
 0x2fa   :  { %5687 = vmatprep.subr.bf16.mxu1 %v8326_v55  ;;  %5831 = vmatprep.subr.bf16.mxu0 %v8326_v55  ;;  %v8476_v38 = vand.u32 4294901760, %v7837_v32  ;;  %v5880_v32 = vpack.c.bf16 %v3151_v14, %v3144_v35 }
 0x301   :  { %5689 = vmatpush3.bf16.xpose.msra.mxu1 %v5688_v48  ;;  %5833 = vmatpush3.bf16.xpose.msra.mxu0 %v5832_v29  ;;  %v8453_v48 = vand.u32 4294901760, %v7587_v2  ;;  %v8458_v2 = vand.u32 4294901760, %v7643_v40  ;;  %v8464_v40 = vand.u32 4294901760, %v7705_v54  ;;  %v8469_v54 = vand.u32 4294901760, %v7772_v5 }
 0x302   :  { %5690 = vmatprep.subr.bf16.mxu1 %v8326_v55  ;;  %5834 = vmatprep.subr.bf16.mxu0 %v8326_v55  ;;  %v8475_v5 = vand.u32 4294901760, %v7832_v58  ;;  %v5736_v58 = vpack.c.bf16 %v2446_v16, %v2439_v10 }
 0x303   :  { %v5715_v29 = vpack.c.bf16 %v8453_v48, %v8452_v43  ;;  %v8460_v43 = vand.u32 4294901760, %v7665_v3  ;;  %v8465_v3 = vand.u32 4294901760, %v7730_v9  ;;  %v8471_v9 = vand.u32 4294901760, %v7782_v28 }
 0x304   :  { %v8477_v28 = vand.u32 4294901760, %v7848_v31 }
 0x308   :  { %4869 = vmatmul.mubr.f32.vlgmr.msra.gmra.mrb[4].mxu1 %v6197_v39  ;;  %5079 = vmatmul.mubr.f32.vlgmr.msra.gmra.mrb[4].mxu0 %v6197_v39 }
 0x309   :  { %5692 = vmatpush3.bf16.xpose.msra.mxu1 %v7275_v63  ;;  %5836 = vmatpush3.bf16.xpose.msra.mxu0 %v7281_v45 }
 0x30a   :  { %5693 = vmatprep.subr.bf16.mxu1 %v8326_v55  ;;  %5837 = vmatprep.subr.bf16.mxu0 %v8326_v55 }
 0x30b   :  { %4903 = vmatprep.mubr.msk.f32.mxu1 %vm6013_vm1, %v8337_v18  ;;  %5113 = vmatprep.mubr.msk.f32.mxu0 %vm6013_vm1, %v8337_v18 }
 0x311   :  { %5695 = vmatpush3.bf16.xpose.msra.mxu1 %v7333_v37  ;;  %5839 = vmatpush3.bf16.xpose.msra.mxu0 %v7339_v7 }
 0x312   :  { %5696 = vmatprep.subr.bf16.mxu1 %v8326_v55  ;;  %5840 = vmatprep.subr.bf16.mxu0 %v8326_v55 }
 0x319   :  { %5698 = vmatpush3.bf16.xpose.msra.mxu1 %v7383_v61  ;;  %5842 = vmatpush3.bf16.xpose.msra.mxu0 %v7389_v57 }
 0x31a   :  { %5699 = vmatprep.subr.bf16.mxu1 %v8326_v55  ;;  %5843 = vmatprep.subr.bf16.mxu0 %v8326_v55 }
 0x31b   :  { %v1474_v39 = vpop.f32.mrb[2].mxu1  ;;  %v2179_v53 = vpop.f32.mrb[2].mxu0 }
 0x31c   :  { %v8012_v33 = vmul.f32 %v7071_v4, %v1474_v39  ;;  %v8015_v51 = vmul.f32 %v7071_v4, %v2179_v53  ;;  %v4555_v22 = vpop.f32.mrb[3].mxu1  ;;  %v4765_v49 = vpop.f32.mrb[3].mxu0  ;;  %v8446_v4 = vld [vmem:[#allocation7_spill] sm:$0xff]  ;;  %v8454_v39 = vand.u32 4294901760, %v7592_v36  ;;  %v8455_v53 = vand.u32 4294901760, %v7597_v21 }
 0x31d   :  { %v8456_v49 = vld [vmem:[#allocation2_spill] sm:$0xff]  ;;  %v5718_v36 = vpack.c.bf16 %v8458_v2, %v8457_v19  ;;  %v8459_v21 = vand.u32 4294901760, %v7660_v13  ;;  %v8466_v13 = vand.u32 4294901760, %v7735_v50  ;;  %v5727_v2 = vpack.c.bf16 %v8470_v60, %v8469_v54 }
 0x31e   :  { %v5859_v22 = vpack.c.bf16 %v8455_v53, %v8454_v39  ;;  %v8462_v39 = vand.u32 4294901760, %v7695_v15  ;;  %v8468_v15 = vand.u32 4294901760, %v7761_v0  ;;  %v8472_v50 = vand.u32 4294901760, %v7787_v62 }
 0x31f   :  { %v5862_v48 = vpack.c.bf16 %v8460_v43, %v8459_v21  ;;  %v8474_v0 = vand.u32 4294901760, %v7815_v20  ;;  %v5874_v43 = vpack.c.bf16 %v8476_v38, %v8475_v5  ;;  %v8478_v62 = vand.u32 4294901760, %v7853_v47 }
 0x320   :  { %v8480_v20 = vand.u32 4294901760, %v7863_v30 }
 0x321   :  { %5701 = vmatpush3.bf16.xpose.msra.mxu1 %v7433_v26  ;;  %5845 = vmatpush3.bf16.xpose.msra.mxu0 %v8443_v42 }
 0x322   :  { %5702 = vmatprep.subr.bf16.mxu1 %v8326_v55  ;;  %5846 = vmatprep.subr.bf16.mxu0 %v8326_v55 }
 0x329   :  { %5704 = vmatpush3.bf16.xpose.msra.mxu1 %v8444_v34  ;;  %5848 = vmatpush3.bf16.xpose.msra.mxu0 %v8445_v44 }
 0x32a   :  { %5705 = vmatprep.subr.bf16.mxu1 %v8326_v55  ;;  %5849 = vmatprep.subr.bf16.mxu0 %v8326_v55 }
 0x331   :  { %5707 = vmatpush3.bf16.xpose.msra.mxu1 %v8446_v4  ;;  %5851 = vmatpush3.bf16.xpose.msra.mxu0 %v8447_v11 }
 0x332   :  { %5708 = vmatprep.subr.bf16.mxu1 %v8326_v55  ;;  %5852 = vmatprep.subr.bf16.mxu0 %v8326_v55 }
 0x339   :  { %5710 = vmatpush3.bf16.xpose.msra.mxu1 %v8448_v46  ;;  %5854 = vmatpush3.bf16.xpose.msra.mxu0 %v8449_v23 }
 0x33a   :  { %5711 = vmatprep.subr.bf16.mxu1 %v8326_v55  ;;  %5855 = vmatprep.subr.bf16.mxu0 %v8326_v55 }
 0x341   :  { %5713 = vmatpush3.bf16.xpose.msra.mxu1 %v8450_v25  ;;  %5857 = vmatpush3.bf16.xpose.msra.mxu0 %v8451_v27 }
 0x342   :  { %5714 = vmatprep.subr.bf16.mxu1 %v8326_v55  ;;  %5858 = vmatprep.subr.bf16.mxu0 %v8326_v55 }
 0x348   :  { %4904 = vmatmul.mubr.f32.vlgmr.msra.gmra.mrb[4].mxu1 %v8456_v49  ;;  %5114 = vmatmul.mubr.f32.vlgmr.msra.gmra.mrb[4].mxu0 %v8456_v49  ;;  %v5724_v49 = vpack.c.bf16 %v8466_v13, %v8465_v3 }
 0x349   :  { %5716 = vmatpush3.bf16.xpose.msra.mxu1 %v5715_v29  ;;  %5860 = vmatpush3.bf16.xpose.msra.mxu0 %v5859_v22  ;;  %v8461_v29 = vand.u32 4294901760, %v7690_v41  ;;  %v5865_v22 = vpack.c.bf16 %v8464_v40, %v8463_v59  ;;  %v8467_v41 = vand.u32 4294901760, %v7756_v56  ;;  %v8473_v56 = vand.u32 4294901760, %v7810_v17 }
 0x34a   :  { %5717 = vmatprep.subr.bf16.mxu1 %v8326_v55  ;;  %5861 = vmatprep.subr.bf16.mxu0 %v8326_v55  ;;  %v8479_v17 = vand.u32 4294901760, %v7858_v1 }
 0x34b   :  { %4938 = vmatprep.mubr.msk.f32.mxu1 %vm6013_vm1, %v8337_v18  ;;  %5148 = vmatprep.mubr.msk.f32.mxu0 %vm6013_vm1, %v8337_v18  ;;  %v5721_v53 = vpack.c.bf16 %v8462_v39, %v8461_v29  ;;  %v5868_v19 = vpack.c.bf16 %v8468_v15, %v8467_v41  ;;  %v5730_v21 = vpack.c.bf16 %v8474_v0, %v8473_v56 }
 0x34c   :  { %v5877_v29 = vpack.c.bf16 %v8480_v20, %v8479_v17 }
 0x351   :  { %5719 = vmatpush3.bf16.xpose.msra.mxu1 %v5718_v36  ;;  %5863 = vmatpush3.bf16.xpose.msra.mxu0 %v5862_v48  ;;  %v5871_v36 = vpack.c.bf16 %v8472_v50, %v8471_v9  ;;  %v5733_v48 = vpack.c.bf16 %v8478_v62, %v8477_v28 }
 0x352   :  { %5720 = vmatprep.subr.bf16.mxu1 %v8326_v55  ;;  %5864 = vmatprep.subr.bf16.mxu0 %v8326_v55 }
 0x359   :  { %5722 = vmatpush3.bf16.xpose.msra.mxu1 %v5721_v53  ;;  %5866 = vmatpush3.bf16.xpose.msra.mxu0 %v5865_v22 }
 0x35a   :  { %5723 = vmatprep.subr.bf16.mxu1 %v8326_v55  ;;  %5867 = vmatprep.subr.bf16.mxu0 %v8326_v55 }
 0x361   :  { %5725 = vmatpush3.bf16.xpose.msra.mxu1 %v5724_v49  ;;  %5869 = vmatpush3.bf16.xpose.msra.mxu0 %v5868_v19 }
 0x362   :  { %5726 = vmatprep.subr.bf16.mxu1 %v8326_v55  ;;  %5870 = vmatprep.subr.bf16.mxu0 %v8326_v55 }
 0x369   :  { %5728 = vmatpush3.bf16.xpose.msra.mxu1 %v5727_v2  ;;  %5872 = vmatpush3.bf16.xpose.msra.mxu0 %v5871_v36 }
 0x36a   :  { %5729 = vmatprep.subr.bf16.mxu1 %v8326_v55  ;;  %5873 = vmatprep.subr.bf16.mxu0 %v8326_v55 }
 0x371   :  { %5731 = vmatpush3.bf16.xpose.msra.mxu1 %v5730_v21  ;;  %5875 = vmatpush3.bf16.xpose.msra.mxu0 %v5874_v43 }
 0x372   :  { %5732 = vmatprep.subr.bf16.mxu1 %v8326_v55  ;;  %5876 = vmatprep.subr.bf16.mxu0 %v8326_v55 }
 0x379   :  { %5734 = vmatpush3.bf16.xpose.msra.mxu1 %v5733_v48  ;;  %5878 = vmatpush3.bf16.xpose.msra.mxu0 %v5877_v29 }
 0x37a   :  { %5735 = vmatprep.subr.bf16.mxu1 %v8326_v55  ;;  %5879 = vmatprep.subr.bf16.mxu0 %v8326_v55 }
 0x381   :  { %5737 = vmatpush3.bf16.xpose.msra.mxu1 %v5736_v58  ;;  %5881 = vmatpush3.bf16.xpose.msra.mxu0 %v5880_v32 }
 0x382   :  { %5738 = vmatprep.subr.bf16.mxu1 %v8326_v55  ;;  %5882 = vmatprep.subr.bf16.mxu0 %v8326_v55 }
 0x388   :  { %4939 = vmatmul.mubr.msk.f32.vlgmr.msra.gmra.mrb[4].mxu1 %vm80_vm0, %v8358_v8  ;;  %5149 = vmatmul.mubr.msk.f32.vlgmr.msra.gmra.mrb[4].mxu0 %vm80_vm0, %v8358_v8 }
 0x389   :  { %5740 = vmatpush3.bf16.xpose.msra.mxu1 %v7275_v63  ;;  %5884 = vmatpush3.bf16.xpose.msra.mxu0 %v7281_v45  ;;  %v3599_v63 = vmax.f32 %v8015_v51, 1e-16 }
 0x38a   :  { %5741 = vmatprep.subr.bf16.mxu1 %v8326_v55  ;;  %5885 = vmatprep.subr.bf16.mxu0 %v8326_v55 }
 0x38b   :  { %4973 = vmatprep.mubr.msk.f32.mxu1 %vm6013_vm1, %v8337_v18  ;;  %5183 = vmatprep.mubr.msk.f32.mxu0 %vm6013_vm1, %v8337_v18  ;;  %v3594_v18 = vmax.f32 %v8012_v33, 1e-16 }
 0x38d   :  { %5960 = vrsqrt.f32 %v3594_v18 }
 0x38e   :  { %5962 = vrsqrt.f32 %v3599_v63 }
 0x391   :  { %5743 = vmatpush3.bf16.xpose.msra.mxu1 %v7333_v37  ;;  %5887 = vmatpush3.bf16.xpose.msra.mxu0 %v7339_v7 }
 0x392   :  { %5744 = vmatprep.subr.bf16.mxu1 %v8326_v55  ;;  %5888 = vmatprep.subr.bf16.mxu0 %v8326_v55 }
 0x397   :  { %v5961_v45 = vpop.eup %5960 }
 0x398   :  { %v5963_v37 = vpop.eup %5962 }
 0x399   :  { %5746 = vmatpush3.bf16.xpose.msra.mxu1 %v7383_v61  ;;  %5890 = vmatpush3.bf16.xpose.msra.mxu0 %v7389_v57 }
 0x39a   :  { %5747 = vmatprep.subr.bf16.mxu1 %v8326_v55  ;;  %5891 = vmatprep.subr.bf16.mxu0 %v8326_v55 }
 0x3a1   :  { %5749 = vmatpush3.bf16.xpose.msra.mxu1 %v7433_v26  ;;  %5893 = vmatpush3.bf16.xpose.msra.mxu0 %v8443_v42 }
 0x3a2   :  { %5750 = vmatprep.subr.bf16.mxu1 %v8326_v55  ;;  %5894 = vmatprep.subr.bf16.mxu0 %v8326_v55 }
 0x3a9   :  { %5752 = vmatpush3.bf16.xpose.msra.mxu1 %v8444_v34  ;;  %5896 = vmatpush3.bf16.xpose.msra.mxu0 %v8445_v44 }
 0x3aa   :  { %5753 = vmatprep.subr.bf16.mxu1 %v8326_v55  ;;  %5897 = vmatprep.subr.bf16.mxu0 %v8326_v55 }
 0x3b1   :  { %5755 = vmatpush3.bf16.xpose.msra.mxu1 %v8446_v4  ;;  %5899 = vmatpush3.bf16.xpose.msra.mxu0 %v8447_v11 }
 0x3b2   :  { %5756 = vmatprep.subr.bf16.mxu1 %v8326_v55  ;;  %5900 = vmatprep.subr.bf16.mxu0 %v8326_v55 }
 0x3b9   :  { %5758 = vmatpush3.bf16.xpose.msra.mxu1 %v8448_v46  ;;  %5902 = vmatpush3.bf16.xpose.msra.mxu0 %v8449_v23 }
 0x3ba   :  { %5759 = vmatprep.subr.bf16.mxu1 %v8326_v55  ;;  %5903 = vmatprep.subr.bf16.mxu0 %v8326_v55 }
 0x3c1   :  { %5761 = vmatpush3.bf16.xpose.msra.mxu1 %v8450_v25  ;;  %5905 = vmatpush3.bf16.xpose.msra.mxu0 %v8451_v27 }
 0x3c8   :  { %4974 = vmatmul.mubr.msk.f32.vlgmr.msra.gmra.mrb[4].mxu1 %vm80_vm0, %v8358_v8  ;;  %5184 = vmatmul.mubr.msk.f32.vlgmr.msra.gmra.mrb[4].mxu0 %vm80_vm0, %v8358_v8 }
 0x49b   :  { %v2884_v7 = vpop.f32.mrb[4].mxu1  ;;  %v3589_v55 = vpop.f32.mrb[4].mxu0 }
 0x49c   :  { %v3596_v61 = vmul.f32 %v5961_v45, %v2884_v7  ;;  %v3601_v57 = vmul.f32 %v5963_v37, %v3589_v55  ;;  %v4975_v26 = vpop.f32.mrb[5].mxu1  ;;  %v5185_v16 = vpop.f32.mrb[5].mxu0 }
 0x49e   :  { %3597 = vst [vmem:[%s8176_s3] sm:$0x1] %v3596_v61  ;;  %3602 = vst [vmem:[%s8177_s4] sm:$0x1] %v3601_v57 }

</bundles_post_ra>
